<compile_context>
chip_gen: v6e
topology: v6e:2x2x1
jax: 0.10.0
libtpu: 0.0.40
codegen_flags: <defaults>
</compile_context>

<pallas_src>
import jax
import jax.numpy as jnp
from jax import lax
from jax.experimental import pallas as pl
from jax.experimental.pallas import tpu as pltpu
import numpy as np


def word_classifier_kernel(x_ref,      # (T, tB, H) f32: emb@W_ih0 + b0, gathered per token
                           w_hh0_ref,  # (H, H)     bf16: layer-0 recurrent weights
                           w_cat_ref,  # (3, 2H, H) bf16: layers 1..3 [W_ih; W_hh] stacked
                           b_cat_ref,  # (3, 1, H)  f32:  layers 1..3 bias (b_ih + b_hh)
                           w_out_ref,  # (H, C)     bf16: final linear weights
                           b_out_ref,  # (1, C)     f32:  final linear bias
                           out_ref):   # (tB, C)    f32
    T, B, H = x_ref.shape
    f32, bf16 = jnp.float32, jnp.bfloat16
    L = 4                                  # number of RNN layers

    zero = jnp.zeros((B, H), f32)
    h = [zero] * L                         # per-layer hidden-state carries (f32)
    acc = zero                             # running time-sum of the last layer

    # Diagonal wavefront: at wave w compute layer l's cell for timestep t=w-l.
    # Every cell of a wave depends only on the previous wave, so their
    # matmul+tanh chains overlap; serial depth is T+L-1 instead of L*T.
    # Cell validity (l <= w < T+l) is a compile-time predicate (static T, L),
    # so invalid cells are simply never emitted and the zero initial hidden
    # state is preserved exactly.
    for w in range(T + L - 1):
        new_h = list(h)
        if w < T:                                          # layer 0, t = w
            new_h[0] = jnp.tanh(
                x_ref[w] + jnp.dot(h[0].astype(bf16), w_hh0_ref[...],
                                   preferred_element_type=f32))
        for l in range(1, L):                              # layers 1..3, t = w-l
            if 0 <= w - l < T:
                cat = jnp.concatenate([h[l - 1], h[l]], axis=-1).astype(bf16)
                new_h[l] = jnp.tanh(
                    jnp.dot(cat, w_cat_ref[l - 1], preferred_element_type=f32)
                    + b_cat_ref[l - 1])
        h = new_h
        if w >= L - 1:                                     # new h[3] == h_3[w-3]
            acc = acc + h[L - 1]

    # mean over time, then final linear (mean(Linear(h)) == Linear(mean(h)))
    mean_h = acc * (1.0 / T)
    out_ref[...] = (jnp.dot(mean_h.astype(bf16), w_out_ref[...],
                            preferred_element_type=f32) + b_out_ref[...])


def _round_up(x, m):
    return ((x + m - 1) // m) * m


def word_classifier_forward(tokens, params, *, batch_tile=None):
    """tokens: (B, T) int32; returns (B, num_classes) float32.

    batch_tile: rows per grid step (multiple of 8).  Default: min(128, B
    rounded up to 8).  For large batches use 128 (v5e) / 256 (v6e, v7x); on
    v7x prefer a tile with B_pad/batch_tile >= 2 so both TensorCores get work.
    """
    f32, bf16 = jnp.float32, jnp.bfloat16
    emb = params["embedding"]                     # (V, E)
    H = params["w_hh0"].shape[0]
    C = params["w_out"].shape[1]
    B, T = tokens.shape

    H_pad = _round_up(H, 128)
    C_pad = _round_up(C, 128)
    if batch_tile is None:
        batch_tile = max(8, min(128, _round_up(B, 8)))
    batch_tile = _round_up(batch_tile, 8)
    B_pad = _round_up(B, batch_tile)
    nb = B_pad // batch_tile

    # ---- fuse embedding + layer-0 input projection + bias into one table ----
    # proj0[v] = emb[v] @ W_ih0 + (b_ih0 + b_hh0).  Row 0 of emb (padding_idx)
    # is zero, so proj0[0] is exactly the bias -- identical to the in-kernel
    # result.  The one-time (V,E)x(E,H) matmul is tiny (V=50).
    proj0 = (emb.astype(f32) @ params["w_ih0"].astype(f32)
             + params["b0"].astype(f32))                       # (V, H)
    proj0 = jnp.pad(proj0, ((0, 0), (0, H_pad - H)))           # (V, H_pad)

    def pad_hh(a):                                             # (H,H)->(H_pad,H_pad)
        return jnp.pad(a.astype(f32), ((0, H_pad - H), (0, H_pad - H)))

    w_hh0_p = pad_hh(params["w_hh0"]).astype(bf16)
    # Layers 1..3: stack [W_ih; W_hh] -> (2*H_pad, H_pad) so each cell is ONE
    # (tB, 2H) x (2H, H) MXU matmul on concat([h_{l-1}[t], h_l[t-1]]).  Each
    # half is padded *before* stacking so the row blocks line up with the
    # lane-axis concat inside the kernel.
    w_cat = jnp.stack([
        jnp.concatenate([pad_hh(params["w_ih_rest"][l]),
                         pad_hh(params["w_hh_rest"][l])], axis=0)
        for l in range(3)]).astype(bf16)                       # (3, 2*H_pad, H_pad)
    b_cat = jnp.stack([
        jnp.pad(params["b_rest"][l].astype(f32), ((0, 0), (0, H_pad - H)))
        for l in range(3)])                                    # (3, 1, H_pad)
    w_out_p = jnp.pad(params["w_out"].astype(f32),
                      ((0, H_pad - H), (0, C_pad - C))).astype(bf16)
    b_out_p = jnp.pad(params["b_out"].astype(f32), ((0, 0), (0, C_pad - C)))

    # Time-major gather of the fused table; padded batch rows use token 0
    # (padding_idx), compute harmless values and are sliced off at the end.
    tok_p = jnp.pad(tokens, ((0, B_pad - B), (0, 0)))
    x = jnp.take(proj0, tok_p.T, axis=0)                       # (T, B_pad, H_pad) f32

    def resident(shape):
        # Full-array block + constant index_map -> stays resident in VMEM.
        n = len(shape)
        return pl.BlockSpec(shape, lambda b, _n=n: (0,) * _n)

    # VMEM budget from the actual footprint (bf16 weights, double-buffered
    # x/out tiles, headroom) -- fits v5e/v6e (128 MiB) and v7x (64 MiB).
    weight_bytes = int(w_hh0_p.size * 2 + w_cat.size * 2 + w_out_p.size * 2
                       + b_cat.size * 4 + b_out_p.size * 4)
    tile_bytes = int(T * batch_tile * H_pad * 4 + batch_tile * C_pad * 4)
    vmem_limit = int(min(100 * 2**20,
                         max(4 * 2**20, 2 * weight_bytes + 4 * tile_bytes + 2**20)))

    cost = pl.CostEstimate(
        flops=int(2 * T * B_pad * 7 * H_pad * H_pad + 2 * B_pad * H_pad * C_pad),
        transcendentals=int(4 * T * B_pad * H_pad),
        bytes_accessed=int(x.size * 4 + weight_bytes + B_pad * C_pad * 4))

    out_padded = pl.pallas_call(
        word_classifier_kernel,
        out_shape=jax.ShapeDtypeStruct((B_pad, C_pad), f32),
        grid=(nb,),
        in_specs=[
            pl.BlockSpec((T, batch_tile, H_pad), lambda b: (0, b, 0)),  # x: batch-tiled
            resident((H_pad, H_pad)),
            resident((3, 2 * H_pad, H_pad)),
            resident((3, 1, H_pad)),
            resident((H_pad, C_pad)),
            resident((1, C_pad)),
        ],
        out_specs=pl.BlockSpec((batch_tile, C_pad), lambda b: (b, 0)),
        compiler_params=pltpu.CompilerParams(
            dimension_semantics=("parallel",),     # batch tiles split across TCs (v7x)
            vmem_limit_bytes=vmem_limit),
        cost_estimate=cost,
    )(x, w_hh0_p, w_cat, b_cat, w_out_p, b_out_p)

    return out_padded[:B, :C]


def init_params(key, vocab, embedding_size, hidden_size, num_classes):
    E, H, C = embedding_size, hidden_size, num_classes
    keys = jax.random.split(key, 19)
    s = 1.0 / np.sqrt(H)

    emb = jax.random.normal(keys[0], (vocab, E), jnp.float32)
    emb = emb.at[0].set(0.0)                             # padding_idx=0

    def u(k, shape):
        return jax.random.uniform(k, shape, jnp.float32, -s, s)

    # layer 0: PyTorch stores W_ih as (H, E); pre-transpose to (E, H).
    w_ih0 = u(keys[1], (H, E)).T
    w_hh0 = u(keys[2], (H, H)).T
    b0 = (u(keys[3], (H,)) + u(keys[4], (H,))).reshape(1, H)      # b_ih + b_hh

    w_ih_rest = jnp.stack([u(keys[5 + i], (H, H)).T for i in range(3)])   # (3, H, H)
    w_hh_rest = jnp.stack([u(keys[8 + i], (H, H)).T for i in range(3)])   # (3, H, H)
    # Two independent bias draws per layer (b_ih + b_hh).
    b_rest = jnp.stack([(u(keys[11 + i], (H,)) + u(keys[14 + i], (H,))).reshape(1, H)
                        for i in range(3)])              # (3, 1, H)

    w_out = u(keys[17], (C, H)).T                        # (H, C)
    b_out = u(keys[18], (C,)).reshape(1, C)

    return {"embedding": emb, "w_ih0": w_ih0, "w_hh0": w_hh0, "b0": b0,
            "w_ih_rest": w_ih_rest, "w_hh_rest": w_hh_rest, "b_rest": b_rest,
            "w_out": w_out, "b_out": b_out}


def reference_forward(tokens, params):
    """Pure-JAX f32 reference matching the PyTorch forward (eval mode)."""
    x = jnp.take(params["embedding"], tokens, axis=0)    # (B, T, E)
    B, T, _ = x.shape
    H = params["w_hh0"].shape[0]

    def run_layer(seq, w_ih, w_hh, b):
        def step(h, x_t):
            h_new = jnp.tanh(x_t @ w_ih + h @ w_hh + b[0])
            return h_new, h_new
        _, outs = lax.scan(step, jnp.zeros((B, H), jnp.float32),
                           jnp.transpose(seq, (1, 0, 2)))
        return jnp.transpose(outs, (1, 0, 2))

    seq = run_layer(x, params["w_ih0"], params["w_hh0"], params["b0"])
    for l in range(3):
        seq = run_layer(seq, params["w_ih_rest"][l], params["w_hh_rest"][l],
                        params["b_rest"][l])
    out = seq @ params["w_out"] + params["b_out"][0]     # (B, T, C)
    return jnp.mean(out, axis=1)


if __name__ == "__main__":
    # Small shapes consistent with the module.
    VOCAB, EMB, HID, NCLS = 50, 16, 32, 5
    T = 8

    key = jax.random.PRNGKey(0)
    k_tok, k_tok2, k_par = jax.random.split(key, 3)
    params = init_params(k_par, VOCAB, EMB, HID, NCLS)

    # bf16 MXU operands -> loosened tolerance vs. the f32 reference.
    ATOL = RTOL = 5e-2

    # Case 1: tiny batch, single tile (nb=1).
    tokens = jax.random.randint(k_tok, (2, T), 0, VOCAB, dtype=jnp.int32)
    out = jax.block_until_ready(word_classifier_forward(tokens, params))
    ref = jax.block_until_ready(reference_forward(tokens, params))
    assert out.shape == (2, NCLS)
    err = np.max(np.abs(np.asarray(out) - np.asarray(ref)))
    assert np.allclose(np.asarray(out), np.asarray(ref), atol=ATOL, rtol=RTOL), \
        f"case1 mismatch: {err}"

    # Case 2: batch > tile and not a multiple of it -> nb=3; exercises the
    # batch-tiled index_maps, out_spec tiling and the "parallel" grid path.
    tokens2 = jax.random.randint(k_tok2, (19, T), 0, VOCAB, dtype=jnp.int32)
    out2 = jax.block_until_ready(
        word_classifier_forward(tokens2, params, batch_tile=8))
    ref2 = jax.block_until_ready(reference_forward(tokens2, params))
    assert out2.shape == (19, NCLS)
    err2 = np.max(np.abs(np.asarray(out2) - np.asarray(ref2)))
    assert np.allclose(np.asarray(out2), np.asarray(ref2), atol=ATOL, rtol=RTOL), \
        f"case2 mismatch: {err2}"

    print("KERNEL_OK")
</pallas_src>

<mosaic_0001>
module attributes {stable_mosaic.version = 11 : i64} {
  func.func @word_classifier_kernel(%arg0: i32, %arg1: memref<8x8x128xf32, #tpu.memory_space<vmem>>, %arg2: memref<128x128xbf16, #tpu.memory_space<vmem>>, %arg3: memref<3x256x128xbf16, #tpu.memory_space<vmem>>, %arg4: memref<3x1x128xf32, #tpu.memory_space<vmem>>, %arg5: memref<128x128xbf16, #tpu.memory_space<vmem>>, %arg6: memref<1x128xf32, #tpu.memory_space<vmem>>, %arg7: memref<8x128xf32, #tpu.memory_space<vmem>>) attributes {dimension_semantics = [#tpu.dimension_semantics<parallel>], iteration_bounds = array<i64: 1>, scalar_prefetch = 0 : i64, scratch_operands = 0 : i64, tpu.core_type = #tpu.core_type<tc>, window_params = [{transform_indices = @transform_0, window_bounds = array<i64: 8, 8, 128>}, {pipeline_mode = #tpu.pipeline_mode<synchronous>, transform_indices = @transform_1, window_bounds = array<i64: 128, 128>}, {pipeline_mode = #tpu.pipeline_mode<synchronous>, transform_indices = @transform_2, window_bounds = array<i64: 3, 256, 128>}, {pipeline_mode = #tpu.pipeline_mode<synchronous>, transform_indices = @transform_3, window_bounds = array<i64: 3, 1, 128>}, {pipeline_mode = #tpu.pipeline_mode<synchronous>, transform_indices = @transform_4, window_bounds = array<i64: 128, 128>}, {pipeline_mode = #tpu.pipeline_mode<synchronous>, transform_indices = @transform_5, window_bounds = array<i64: 1, 128>}, {transform_indices = @transform_6, window_bounds = array<i64: 8, 128>}]} {
    %cst = arith.constant 0.000000e+00 : f32
    %0 = vector.broadcast %cst : f32 to vector<8x128xf32>
    %c0 = arith.constant 0 : index
    %c0_0 = arith.constant 0 : index
    %c0_1 = arith.constant 0 : index
    %1 = vector.load %arg1[%c0, %c0_0, %c0_1] : memref<8x8x128xf32, #tpu.memory_space<vmem>>, vector<1x8x128xf32>
    %2 = vector.shape_cast %1 : vector<1x8x128xf32> to vector<8x128xf32>
    %3 = arith.truncf %0 : vector<8x128xf32> to vector<8x128xbf16>
    %c0_2 = arith.constant 0 : index
    %c0_3 = arith.constant 0 : index
    %4 = vector.load %arg2[%c0_2, %c0_3] : memref<128x128xbf16, #tpu.memory_space<vmem>>, vector<128x128xbf16>
    %cst_4 = arith.constant dense<0.000000e+00> : vector<8x128xf32>
    %5 = tpu.matmul %3, %4, %cst_4 {dimension_numbers = #tpu.dot_dimension_numbers<[1], [0], [0], [1], [0, 0, 1, 1], [], []>} : vector<8x128xbf16>, vector<128x128xbf16>, vector<8x128xf32> -> vector<8x128xf32>
    %6 = arith.addf %2, %5 : vector<8x128xf32>
    %7 = math.tanh %6 : vector<8x128xf32>
    %c1 = arith.constant 1 : index
    %c0_5 = arith.constant 0 : index
    %c0_6 = arith.constant 0 : index
    %8 = vector.load %arg1[%c1, %c0_5, %c0_6] : memref<8x8x128xf32, #tpu.memory_space<vmem>>, vector<1x8x128xf32>
    %9 = vector.shape_cast %8 : vector<1x8x128xf32> to vector<8x128xf32>
    %10 = arith.truncf %7 : vector<8x128xf32> to vector<8x128xbf16>
    %c0_7 = arith.constant 0 : index
    %c0_8 = arith.constant 0 : index
    %11 = vector.load %arg2[%c0_7, %c0_8] : memref<128x128xbf16, #tpu.memory_space<vmem>>, vector<128x128xbf16>
    %cst_9 = arith.constant dense<0.000000e+00> : vector<8x128xf32>
    %12 = tpu.matmul %10, %11, %cst_9 {dimension_numbers = #tpu.dot_dimension_numbers<[1], [0], [0], [1], [0, 0, 1, 1], [], []>} : vector<8x128xbf16>, vector<128x128xbf16>, vector<8x128xf32> -> vector<8x128xf32>
    %13 = arith.addf %9, %12 : vector<8x128xf32>
    %14 = math.tanh %13 : vector<8x128xf32>
    %15 = tpu.concatenate %7, %0 in 1 : vector<8x128xf32>, vector<8x128xf32> -> vector<8x256xf32>
    %16 = arith.truncf %15 : vector<8x256xf32> to vector<8x256xbf16>
    %c0_10 = arith.constant 0 : index
    %c0_11 = arith.constant 0 : index
    %c0_12 = arith.constant 0 : index
    %17 = vector.load %arg3[%c0_10, %c0_11, %c0_12] : memref<3x256x128xbf16, #tpu.memory_space<vmem>>, vector<1x256x128xbf16>
    %18 = vector.shape_cast %17 : vector<1x256x128xbf16> to vector<256x128xbf16>
    %cst_13 = arith.constant dense<0.000000e+00> : vector<8x128xf32>
    %19 = tpu.matmul %16, %18, %cst_13 {dimension_numbers = #tpu.dot_dimension_numbers<[1], [0], [0], [1], [0, 0, 1, 1], [], []>} : vector<8x256xbf16>, vector<256x128xbf16>, vector<8x128xf32> -> vector<8x128xf32>
    %c0_14 = arith.constant 0 : index
    %c0_15 = arith.constant 0 : index
    %c0_16 = arith.constant 0 : index
    %20 = vector.load %arg4[%c0_14, %c0_15, %c0_16] : memref<3x1x128xf32, #tpu.memory_space<vmem>>, vector<1x1x128xf32>
    %21 = vector.shape_cast %20 : vector<1x1x128xf32> to vector<1x128xf32>
    %22 = vector.broadcast %21 : vector<1x128xf32> to vector<8x128xf32>
    %23 = arith.addf %19, %22 : vector<8x128xf32>
    %24 = math.tanh %23 : vector<8x128xf32>
    %c2 = arith.constant 2 : index
    %c0_17 = arith.constant 0 : index
    %c0_18 = arith.constant 0 : index
    %25 = vector.load %arg1[%c2, %c0_17, %c0_18] : memref<8x8x128xf32, #tpu.memory_space<vmem>>, vector<1x8x128xf32>
    %26 = vector.shape_cast %25 : vector<1x8x128xf32> to vector<8x128xf32>
    %27 = arith.truncf %14 : vector<8x128xf32> to vector<8x128xbf16>
    %c0_19 = arith.constant 0 : index
    %c0_20 = arith.constant 0 : index
    %28 = vector.load %arg2[%c0_19, %c0_20] : memref<128x128xbf16, #tpu.memory_space<vmem>>, vector<128x128xbf16>
    %cst_21 = arith.constant dense<0.000000e+00> : vector<8x128xf32>
    %29 = tpu.matmul %27, %28, %cst_21 {dimension_numbers = #tpu.dot_dimension_numbers<[1], [0], [0], [1], [0, 0, 1, 1], [], []>} : vector<8x128xbf16>, vector<128x128xbf16>, vector<8x128xf32> -> vector<8x128xf32>
    %30 = arith.addf %26, %29 : vector<8x128xf32>
    %31 = math.tanh %30 : vector<8x128xf32>
    %32 = tpu.concatenate %14, %24 in 1 : vector<8x128xf32>, vector<8x128xf32> -> vector<8x256xf32>
    %33 = arith.truncf %32 : vector<8x256xf32> to vector<8x256xbf16>
    %c0_22 = arith.constant 0 : index
    %c0_23 = arith.constant 0 : index
    %c0_24 = arith.constant 0 : index
    %34 = vector.load %arg3[%c0_22, %c0_23, %c0_24] : memref<3x256x128xbf16, #tpu.memory_space<vmem>>, vector<1x256x128xbf16>
    %35 = vector.shape_cast %34 : vector<1x256x128xbf16> to vector<256x128xbf16>
    %cst_25 = arith.constant dense<0.000000e+00> : vector<8x128xf32>
    %36 = tpu.matmul %33, %35, %cst_25 {dimension_numbers = #tpu.dot_dimension_numbers<[1], [0], [0], [1], [0, 0, 1, 1], [], []>} : vector<8x256xbf16>, vector<256x128xbf16>, vector<8x128xf32> -> vector<8x128xf32>
    %c0_26 = arith.constant 0 : index
    %c0_27 = arith.constant 0 : index
    %c0_28 = arith.constant 0 : index
    %37 = vector.load %arg4[%c0_26, %c0_27, %c0_28] : memref<3x1x128xf32, #tpu.memory_space<vmem>>, vector<1x1x128xf32>
    %38 = vector.shape_cast %37 : vector<1x1x128xf32> to vector<1x128xf32>
    %39 = vector.broadcast %38 : vector<1x128xf32> to vector<8x128xf32>
    %40 = arith.addf %36, %39 : vector<8x128xf32>
    %41 = math.tanh %40 : vector<8x128xf32>
    %42 = tpu.concatenate %24, %0 in 1 : vector<8x128xf32>, vector<8x128xf32> -> vector<8x256xf32>
    %43 = arith.truncf %42 : vector<8x256xf32> to vector<8x256xbf16>
    %c1_29 = arith.constant 1 : index
    %c0_30 = arith.constant 0 : index
    %c0_31 = arith.constant 0 : index
    %44 = vector.load %arg3[%c1_29, %c0_30, %c0_31] : memref<3x256x128xbf16, #tpu.memory_space<vmem>>, vector<1x256x128xbf16>
    %45 = vector.shape_cast %44 : vector<1x256x128xbf16> to vector<256x128xbf16>
    %cst_32 = arith.constant dense<0.000000e+00> : vector<8x128xf32>
    %46 = tpu.matmul %43, %45, %cst_32 {dimension_numbers = #tpu.dot_dimension_numbers<[1], [0], [0], [1], [0, 0, 1, 1], [], []>} : vector<8x256xbf16>, vector<256x128xbf16>, vector<8x128xf32> -> vector<8x128xf32>
    %c1_33 = arith.constant 1 : index
    %c0_34 = arith.constant 0 : index
    %c0_35 = arith.constant 0 : index
    %47 = vector.load %arg4[%c1_33, %c0_34, %c0_35] : memref<3x1x128xf32, #tpu.memory_space<vmem>>, vector<1x1x128xf32>
    %48 = vector.shape_cast %47 : vector<1x1x128xf32> to vector<1x128xf32>
    %49 = vector.broadcast %48 : vector<1x128xf32> to vector<8x128xf32>
    %50 = arith.addf %46, %49 : vector<8x128xf32>
    %51 = math.tanh %50 : vector<8x128xf32>
    %c3 = arith.constant 3 : index
    %c0_36 = arith.constant 0 : index
    %c0_37 = arith.constant 0 : index
    %52 = vector.load %arg1[%c3, %c0_36, %c0_37] : memref<8x8x128xf32, #tpu.memory_space<vmem>>, vector<1x8x128xf32>
    %53 = vector.shape_cast %52 : vector<1x8x128xf32> to vector<8x128xf32>
    %54 = arith.truncf %31 : vector<8x128xf32> to vector<8x128xbf16>
    %c0_38 = arith.constant 0 : index
    %c0_39 = arith.constant 0 : index
    %55 = vector.load %arg2[%c0_38, %c0_39] : memref<128x128xbf16, #tpu.memory_space<vmem>>, vector<128x128xbf16>
    %cst_40 = arith.constant dense<0.000000e+00> : vector<8x128xf32>
    %56 = tpu.matmul %54, %55, %cst_40 {dimension_numbers = #tpu.dot_dimension_numbers<[1], [0], [0], [1], [0, 0, 1, 1], [], []>} : vector<8x128xbf16>, vector<128x128xbf16>, vector<8x128xf32> -> vector<8x128xf32>
    %57 = arith.addf %53, %56 : vector<8x128xf32>
    %58 = math.tanh %57 : vector<8x128xf32>
    %59 = tpu.concatenate %31, %41 in 1 : vector<8x128xf32>, vector<8x128xf32> -> vector<8x256xf32>
    %60 = arith.truncf %59 : vector<8x256xf32> to vector<8x256xbf16>
    %c0_41 = arith.constant 0 : index
    %c0_42 = arith.constant 0 : index
    %c0_43 = arith.constant 0 : index
    %61 = vector.load %arg3[%c0_41, %c0_42, %c0_43] : memref<3x256x128xbf16, #tpu.memory_space<vmem>>, vector<1x256x128xbf16>
    %62 = vector.shape_cast %61 : vector<1x256x128xbf16> to vector<256x128xbf16>
    %cst_44 = arith.constant dense<0.000000e+00> : vector<8x128xf32>
    %63 = tpu.matmul %60, %62, %cst_44 {dimension_numbers = #tpu.dot_dimension_numbers<[1], [0], [0], [1], [0, 0, 1, 1], [], []>} : vector<8x256xbf16>, vector<256x128xbf16>, vector<8x128xf32> -> vector<8x128xf32>
    %c0_45 = arith.constant 0 : index
    %c0_46 = arith.constant 0 : index
    %c0_47 = arith.constant 0 : index
    %64 = vector.load %arg4[%c0_45, %c0_46, %c0_47] : memref<3x1x128xf32, #tpu.memory_space<vmem>>, vector<1x1x128xf32>
    %65 = vector.shape_cast %64 : vector<1x1x128xf32> to vector<1x128xf32>
    %66 = vector.broadcast %65 : vector<1x128xf32> to vector<8x128xf32>
    %67 = arith.addf %63, %66 : vector<8x128xf32>
    %68 = math.tanh %67 : vector<8x128xf32>
    %69 = tpu.concatenate %41, %51 in 1 : vector<8x128xf32>, vector<8x128xf32> -> vector<8x256xf32>
    %70 = arith.truncf %69 : vector<8x256xf32> to vector<8x256xbf16>
    %c1_48 = arith.constant 1 : index
    %c0_49 = arith.constant 0 : index
    %c0_50 = arith.constant 0 : index
    %71 = vector.load %arg3[%c1_48, %c0_49, %c0_50] : memref<3x256x128xbf16, #tpu.memory_space<vmem>>, vector<1x256x128xbf16>
    %72 = vector.shape_cast %71 : vector<1x256x128xbf16> to vector<256x128xbf16>
    %cst_51 = arith.constant dense<0.000000e+00> : vector<8x128xf32>
    %73 = tpu.matmul %70, %72, %cst_51 {dimension_numbers = #tpu.dot_dimension_numbers<[1], [0], [0], [1], [0, 0, 1, 1], [], []>} : vector<8x256xbf16>, vector<256x128xbf16>, vector<8x128xf32> -> vector<8x128xf32>
    %c1_52 = arith.constant 1 : index
    %c0_53 = arith.constant 0 : index
    %c0_54 = arith.constant 0 : index
    %74 = vector.load %arg4[%c1_52, %c0_53, %c0_54] : memref<3x1x128xf32, #tpu.memory_space<vmem>>, vector<1x1x128xf32>
    %75 = vector.shape_cast %74 : vector<1x1x128xf32> to vector<1x128xf32>
    %76 = vector.broadcast %75 : vector<1x128xf32> to vector<8x128xf32>
    %77 = arith.addf %73, %76 : vector<8x128xf32>
    %78 = math.tanh %77 : vector<8x128xf32>
    %79 = tpu.concatenate %51, %0 in 1 : vector<8x128xf32>, vector<8x128xf32> -> vector<8x256xf32>
    %80 = arith.truncf %79 : vector<8x256xf32> to vector<8x256xbf16>
    %c2_55 = arith.constant 2 : index
    %c0_56 = arith.constant 0 : index
    %c0_57 = arith.constant 0 : index
    %81 = vector.load %arg3[%c2_55, %c0_56, %c0_57] : memref<3x256x128xbf16, #tpu.memory_space<vmem>>, vector<1x256x128xbf16>
    %82 = vector.shape_cast %81 : vector<1x256x128xbf16> to vector<256x128xbf16>
    %cst_58 = arith.constant dense<0.000000e+00> : vector<8x128xf32>
    %83 = tpu.matmul %80, %82, %cst_58 {dimension_numbers = #tpu.dot_dimension_numbers<[1], [0], [0], [1], [0, 0, 1, 1], [], []>} : vector<8x256xbf16>, vector<256x128xbf16>, vector<8x128xf32> -> vector<8x128xf32>
    %c2_59 = arith.constant 2 : index
    %c0_60 = arith.constant 0 : index
    %c0_61 = arith.constant 0 : index
    %84 = vector.load %arg4[%c2_59, %c0_60, %c0_61] : memref<3x1x128xf32, #tpu.memory_space<vmem>>, vector<1x1x128xf32>
    %85 = vector.shape_cast %84 : vector<1x1x128xf32> to vector<1x128xf32>
    %86 = vector.broadcast %85 : vector<1x128xf32> to vector<8x128xf32>
    %87 = arith.addf %83, %86 : vector<8x128xf32>
    %88 = math.tanh %87 : vector<8x128xf32>
    %89 = arith.addf %0, %88 : vector<8x128xf32>
    %c4 = arith.constant 4 : index
    %c0_62 = arith.constant 0 : index
    %c0_63 = arith.constant 0 : index
    %90 = vector.load %arg1[%c4, %c0_62, %c0_63] : memref<8x8x128xf32, #tpu.memory_space<vmem>>, vector<1x8x128xf32>
    %91 = vector.shape_cast %90 : vector<1x8x128xf32> to vector<8x128xf32>
    %92 = arith.truncf %58 : vector<8x128xf32> to vector<8x128xbf16>
    %c0_64 = arith.constant 0 : index
    %c0_65 = arith.constant 0 : index
    %93 = vector.load %arg2[%c0_64, %c0_65] : memref<128x128xbf16, #tpu.memory_space<vmem>>, vector<128x128xbf16>
    %cst_66 = arith.constant dense<0.000000e+00> : vector<8x128xf32>
    %94 = tpu.matmul %92, %93, %cst_66 {dimension_numbers = #tpu.dot_dimension_numbers<[1], [0], [0], [1], [0, 0, 1, 1], [], []>} : vector<8x128xbf16>, vector<128x128xbf16>, vector<8x128xf32> -> vector<8x128xf32>
    %95 = arith.addf %91, %94 : vector<8x128xf32>
    %96 = math.tanh %95 : vector<8x128xf32>
    %97 = tpu.concatenate %58, %68 in 1 : vector<8x128xf32>, vector<8x128xf32> -> vector<8x256xf32>
    %98 = arith.truncf %97 : vector<8x256xf32> to vector<8x256xbf16>
    %c0_67 = arith.constant 0 : index
    %c0_68 = arith.constant 0 : index
    %c0_69 = arith.constant 0 : index
    %99 = vector.load %arg3[%c0_67, %c0_68, %c0_69] : memref<3x256x128xbf16, #tpu.memory_space<vmem>>, vector<1x256x128xbf16>
    %100 = vector.shape_cast %99 : vector<1x256x128xbf16> to vector<256x128xbf16>
    %cst_70 = arith.constant dense<0.000000e+00> : vector<8x128xf32>
    %101 = tpu.matmul %98, %100, %cst_70 {dimension_numbers = #tpu.dot_dimension_numbers<[1], [0], [0], [1], [0, 0, 1, 1], [], []>} : vector<8x256xbf16>, vector<256x128xbf16>, vector<8x128xf32> -> vector<8x128xf32>
    %c0_71 = arith.constant 0 : index
    %c0_72 = arith.constant 0 : index
    %c0_73 = arith.constant 0 : index
    %102 = vector.load %arg4[%c0_71, %c0_72, %c0_73] : memref<3x1x128xf32, #tpu.memory_space<vmem>>, vector<1x1x128xf32>
    %103 = vector.shape_cast %102 : vector<1x1x128xf32> to vector<1x128xf32>
    %104 = vector.broadcast %103 : vector<1x128xf32> to vector<8x128xf32>
    %105 = arith.addf %101, %104 : vector<8x128xf32>
    %106 = math.tanh %105 : vector<8x128xf32>
    %107 = tpu.concatenate %68, %78 in 1 : vector<8x128xf32>, vector<8x128xf32> -> vector<8x256xf32>
    %108 = arith.truncf %107 : vector<8x256xf32> to vector<8x256xbf16>
    %c1_74 = arith.constant 1 : index
    %c0_75 = arith.constant 0 : index
    %c0_76 = arith.constant 0 : index
    %109 = vector.load %arg3[%c1_74, %c0_75, %c0_76] : memref<3x256x128xbf16, #tpu.memory_space<vmem>>, vector<1x256x128xbf16>
    %110 = vector.shape_cast %109 : vector<1x256x128xbf16> to vector<256x128xbf16>
    %cst_77 = arith.constant dense<0.000000e+00> : vector<8x128xf32>
    %111 = tpu.matmul %108, %110, %cst_77 {dimension_numbers = #tpu.dot_dimension_numbers<[1], [0], [0], [1], [0, 0, 1, 1], [], []>} : vector<8x256xbf16>, vector<256x128xbf16>, vector<8x128xf32> -> vector<8x128xf32>
    %c1_78 = arith.constant 1 : index
    %c0_79 = arith.constant 0 : index
    %c0_80 = arith.constant 0 : index
    %112 = vector.load %arg4[%c1_78, %c0_79, %c0_80] : memref<3x1x128xf32, #tpu.memory_space<vmem>>, vector<1x1x128xf32>
    %113 = vector.shape_cast %112 : vector<1x1x128xf32> to vector<1x128xf32>
    %114 = vector.broadcast %113 : vector<1x128xf32> to vector<8x128xf32>
    %115 = arith.addf %111, %114 : vector<8x128xf32>
    %116 = math.tanh %115 : vector<8x128xf32>
    %117 = tpu.concatenate %78, %88 in 1 : vector<8x128xf32>, vector<8x128xf32> -> vector<8x256xf32>
    %118 = arith.truncf %117 : vector<8x256xf32> to vector<8x256xbf16>
    %c2_81 = arith.constant 2 : index
    %c0_82 = arith.constant 0 : index
    %c0_83 = arith.constant 0 : index
    %119 = vector.load %arg3[%c2_81, %c0_82, %c0_83] : memref<3x256x128xbf16, #tpu.memory_space<vmem>>, vector<1x256x128xbf16>
    %120 = vector.shape_cast %119 : vector<1x256x128xbf16> to vector<256x128xbf16>
    %cst_84 = arith.constant dense<0.000000e+00> : vector<8x128xf32>
    %121 = tpu.matmul %118, %120, %cst_84 {dimension_numbers = #tpu.dot_dimension_numbers<[1], [0], [0], [1], [0, 0, 1, 1], [], []>} : vector<8x256xbf16>, vector<256x128xbf16>, vector<8x128xf32> -> vector<8x128xf32>
    %c2_85 = arith.constant 2 : index
    %c0_86 = arith.constant 0 : index
    %c0_87 = arith.constant 0 : index
    %122 = vector.load %arg4[%c2_85, %c0_86, %c0_87] : memref<3x1x128xf32, #tpu.memory_space<vmem>>, vector<1x1x128xf32>
    %123 = vector.shape_cast %122 : vector<1x1x128xf32> to vector<1x128xf32>
    %124 = vector.broadcast %123 : vector<1x128xf32> to vector<8x128xf32>
    %125 = arith.addf %121, %124 : vector<8x128xf32>
    %126 = math.tanh %125 : vector<8x128xf32>
    %127 = arith.addf %89, %126 : vector<8x128xf32>
    %c5 = arith.constant 5 : index
    %c0_88 = arith.constant 0 : index
    %c0_89 = arith.constant 0 : index
    %128 = vector.load %arg1[%c5, %c0_88, %c0_89] : memref<8x8x128xf32, #tpu.memory_space<vmem>>, vector<1x8x128xf32>
    %129 = vector.shape_cast %128 : vector<1x8x128xf32> to vector<8x128xf32>
    %130 = arith.truncf %96 : vector<8x128xf32> to vector<8x128xbf16>
    %c0_90 = arith.constant 0 : index
    %c0_91 = arith.constant 0 : index
    %131 = vector.load %arg2[%c0_90, %c0_91] : memref<128x128xbf16, #tpu.memory_space<vmem>>, vector<128x128xbf16>
    %cst_92 = arith.constant dense<0.000000e+00> : vector<8x128xf32>
    %132 = tpu.matmul %130, %131, %cst_92 {dimension_numbers = #tpu.dot_dimension_numbers<[1], [0], [0], [1], [0, 0, 1, 1], [], []>} : vector<8x128xbf16>, vector<128x128xbf16>, vector<8x128xf32> -> vector<8x128xf32>
    %133 = arith.addf %129, %132 : vector<8x128xf32>
    %134 = math.tanh %133 : vector<8x128xf32>
    %135 = tpu.concatenate %96, %106 in 1 : vector<8x128xf32>, vector<8x128xf32> -> vector<8x256xf32>
    %136 = arith.truncf %135 : vector<8x256xf32> to vector<8x256xbf16>
    %c0_93 = arith.constant 0 : index
    %c0_94 = arith.constant 0 : index
    %c0_95 = arith.constant 0 : index
    %137 = vector.load %arg3[%c0_93, %c0_94, %c0_95] : memref<3x256x128xbf16, #tpu.memory_space<vmem>>, vector<1x256x128xbf16>
    %138 = vector.shape_cast %137 : vector<1x256x128xbf16> to vector<256x128xbf16>
    %cst_96 = arith.constant dense<0.000000e+00> : vector<8x128xf32>
    %139 = tpu.matmul %136, %138, %cst_96 {dimension_numbers = #tpu.dot_dimension_numbers<[1], [0], [0], [1], [0, 0, 1, 1], [], []>} : vector<8x256xbf16>, vector<256x128xbf16>, vector<8x128xf32> -> vector<8x128xf32>
    %c0_97 = arith.constant 0 : index
    %c0_98 = arith.constant 0 : index
    %c0_99 = arith.constant 0 : index
    %140 = vector.load %arg4[%c0_97, %c0_98, %c0_99] : memref<3x1x128xf32, #tpu.memory_space<vmem>>, vector<1x1x128xf32>
    %141 = vector.shape_cast %140 : vector<1x1x128xf32> to vector<1x128xf32>
    %142 = vector.broadcast %141 : vector<1x128xf32> to vector<8x128xf32>
    %143 = arith.addf %139, %142 : vector<8x128xf32>
    %144 = math.tanh %143 : vector<8x128xf32>
    %145 = tpu.concatenate %106, %116 in 1 : vector<8x128xf32>, vector<8x128xf32> -> vector<8x256xf32>
    %146 = arith.truncf %145 : vector<8x256xf32> to vector<8x256xbf16>
    %c1_100 = arith.constant 1 : index
    %c0_101 = arith.constant 0 : index
    %c0_102 = arith.constant 0 : index
    %147 = vector.load %arg3[%c1_100, %c0_101, %c0_102] : memref<3x256x128xbf16, #tpu.memory_space<vmem>>, vector<1x256x128xbf16>
    %148 = vector.shape_cast %147 : vector<1x256x128xbf16> to vector<256x128xbf16>
    %cst_103 = arith.constant dense<0.000000e+00> : vector<8x128xf32>
    %149 = tpu.matmul %146, %148, %cst_103 {dimension_numbers = #tpu.dot_dimension_numbers<[1], [0], [0], [1], [0, 0, 1, 1], [], []>} : vector<8x256xbf16>, vector<256x128xbf16>, vector<8x128xf32> -> vector<8x128xf32>
    %c1_104 = arith.constant 1 : index
    %c0_105 = arith.constant 0 : index
    %c0_106 = arith.constant 0 : index
    %150 = vector.load %arg4[%c1_104, %c0_105, %c0_106] : memref<3x1x128xf32, #tpu.memory_space<vmem>>, vector<1x1x128xf32>
    %151 = vector.shape_cast %150 : vector<1x1x128xf32> to vector<1x128xf32>
    %152 = vector.broadcast %151 : vector<1x128xf32> to vector<8x128xf32>
    %153 = arith.addf %149, %152 : vector<8x128xf32>
    %154 = math.tanh %153 : vector<8x128xf32>
    %155 = tpu.concatenate %116, %126 in 1 : vector<8x128xf32>, vector<8x128xf32> -> vector<8x256xf32>
    %156 = arith.truncf %155 : vector<8x256xf32> to vector<8x256xbf16>
    %c2_107 = arith.constant 2 : index
    %c0_108 = arith.constant 0 : index
    %c0_109 = arith.constant 0 : index
    %157 = vector.load %arg3[%c2_107, %c0_108, %c0_109] : memref<3x256x128xbf16, #tpu.memory_space<vmem>>, vector<1x256x128xbf16>
    %158 = vector.shape_cast %157 : vector<1x256x128xbf16> to vector<256x128xbf16>
    %cst_110 = arith.constant dense<0.000000e+00> : vector<8x128xf32>
    %159 = tpu.matmul %156, %158, %cst_110 {dimension_numbers = #tpu.dot_dimension_numbers<[1], [0], [0], [1], [0, 0, 1, 1], [], []>} : vector<8x256xbf16>, vector<256x128xbf16>, vector<8x128xf32> -> vector<8x128xf32>
    %c2_111 = arith.constant 2 : index
    %c0_112 = arith.constant 0 : index
    %c0_113 = arith.constant 0 : index
    %160 = vector.load %arg4[%c2_111, %c0_112, %c0_113] : memref<3x1x128xf32, #tpu.memory_space<vmem>>, vector<1x1x128xf32>
    %161 = vector.shape_cast %160 : vector<1x1x128xf32> to vector<1x128xf32>
    %162 = vector.broadcast %161 : vector<1x128xf32> to vector<8x128xf32>
    %163 = arith.addf %159, %162 : vector<8x128xf32>
    %164 = math.tanh %163 : vector<8x128xf32>
    %165 = arith.addf %127, %164 : vector<8x128xf32>
    %c6 = arith.constant 6 : index
    %c0_114 = arith.constant 0 : index
    %c0_115 = arith.constant 0 : index
    %166 = vector.load %arg1[%c6, %c0_114, %c0_115] : memref<8x8x128xf32, #tpu.memory_space<vmem>>, vector<1x8x128xf32>
    %167 = vector.shape_cast %166 : vector<1x8x128xf32> to vector<8x128xf32>
    %168 = arith.truncf %134 : vector<8x128xf32> to vector<8x128xbf16>
    %c0_116 = arith.constant 0 : index
    %c0_117 = arith.constant 0 : index
    %169 = vector.load %arg2[%c0_116, %c0_117] : memref<128x128xbf16, #tpu.memory_space<vmem>>, vector<128x128xbf16>
    %cst_118 = arith.constant dense<0.000000e+00> : vector<8x128xf32>
    %170 = tpu.matmul %168, %169, %cst_118 {dimension_numbers = #tpu.dot_dimension_numbers<[1], [0], [0], [1], [0, 0, 1, 1], [], []>} : vector<8x128xbf16>, vector<128x128xbf16>, vector<8x128xf32> -> vector<8x128xf32>
    %171 = arith.addf %167, %170 : vector<8x128xf32>
    %172 = math.tanh %171 : vector<8x128xf32>
    %173 = tpu.concatenate %134, %144 in 1 : vector<8x128xf32>, vector<8x128xf32> -> vector<8x256xf32>
    %174 = arith.truncf %173 : vector<8x256xf32> to vector<8x256xbf16>
    %c0_119 = arith.constant 0 : index
    %c0_120 = arith.constant 0 : index
    %c0_121 = arith.constant 0 : index
    %175 = vector.load %arg3[%c0_119, %c0_120, %c0_121] : memref<3x256x128xbf16, #tpu.memory_space<vmem>>, vector<1x256x128xbf16>
    %176 = vector.shape_cast %175 : vector<1x256x128xbf16> to vector<256x128xbf16>
    %cst_122 = arith.constant dense<0.000000e+00> : vector<8x128xf32>
    %177 = tpu.matmul %174, %176, %cst_122 {dimension_numbers = #tpu.dot_dimension_numbers<[1], [0], [0], [1], [0, 0, 1, 1], [], []>} : vector<8x256xbf16>, vector<256x128xbf16>, vector<8x128xf32> -> vector<8x128xf32>
    %c0_123 = arith.constant 0 : index
    %c0_124 = arith.constant 0 : index
    %c0_125 = arith.constant 0 : index
    %178 = vector.load %arg4[%c0_123, %c0_124, %c0_125] : memref<3x1x128xf32, #tpu.memory_space<vmem>>, vector<1x1x128xf32>
    %179 = vector.shape_cast %178 : vector<1x1x128xf32> to vector<1x128xf32>
    %180 = vector.broadcast %179 : vector<1x128xf32> to vector<8x128xf32>
    %181 = arith.addf %177, %180 : vector<8x128xf32>
    %182 = math.tanh %181 : vector<8x128xf32>
    %183 = tpu.concatenate %144, %154 in 1 : vector<8x128xf32>, vector<8x128xf32> -> vector<8x256xf32>
    %184 = arith.truncf %183 : vector<8x256xf32> to vector<8x256xbf16>
    %c1_126 = arith.constant 1 : index
    %c0_127 = arith.constant 0 : index
    %c0_128 = arith.constant 0 : index
    %185 = vector.load %arg3[%c1_126, %c0_127, %c0_128] : memref<3x256x128xbf16, #tpu.memory_space<vmem>>, vector<1x256x128xbf16>
    %186 = vector.shape_cast %185 : vector<1x256x128xbf16> to vector<256x128xbf16>
    %cst_129 = arith.constant dense<0.000000e+00> : vector<8x128xf32>
    %187 = tpu.matmul %184, %186, %cst_129 {dimension_numbers = #tpu.dot_dimension_numbers<[1], [0], [0], [1], [0, 0, 1, 1], [], []>} : vector<8x256xbf16>, vector<256x128xbf16>, vector<8x128xf32> -> vector<8x128xf32>
    %c1_130 = arith.constant 1 : index
    %c0_131 = arith.constant 0 : index
    %c0_132 = arith.constant 0 : index
    %188 = vector.load %arg4[%c1_130, %c0_131, %c0_132] : memref<3x1x128xf32, #tpu.memory_space<vmem>>, vector<1x1x128xf32>
    %189 = vector.shape_cast %188 : vector<1x1x128xf32> to vector<1x128xf32>
    %190 = vector.broadcast %189 : vector<1x128xf32> to vector<8x128xf32>
    %191 = arith.addf %187, %190 : vector<8x128xf32>
    %192 = math.tanh %191 : vector<8x128xf32>
    %193 = tpu.concatenate %154, %164 in 1 : vector<8x128xf32>, vector<8x128xf32> -> vector<8x256xf32>
    %194 = arith.truncf %193 : vector<8x256xf32> to vector<8x256xbf16>
    %c2_133 = arith.constant 2 : index
    %c0_134 = arith.constant 0 : index
    %c0_135 = arith.constant 0 : index
    %195 = vector.load %arg3[%c2_133, %c0_134, %c0_135] : memref<3x256x128xbf16, #tpu.memory_space<vmem>>, vector<1x256x128xbf16>
    %196 = vector.shape_cast %195 : vector<1x256x128xbf16> to vector<256x128xbf16>
    %cst_136 = arith.constant dense<0.000000e+00> : vector<8x128xf32>
    %197 = tpu.matmul %194, %196, %cst_136 {dimension_numbers = #tpu.dot_dimension_numbers<[1], [0], [0], [1], [0, 0, 1, 1], [], []>} : vector<8x256xbf16>, vector<256x128xbf16>, vector<8x128xf32> -> vector<8x128xf32>
    %c2_137 = arith.constant 2 : index
    %c0_138 = arith.constant 0 : index
    %c0_139 = arith.constant 0 : index
    %198 = vector.load %arg4[%c2_137, %c0_138, %c0_139] : memref<3x1x128xf32, #tpu.memory_space<vmem>>, vector<1x1x128xf32>
    %199 = vector.shape_cast %198 : vector<1x1x128xf32> to vector<1x128xf32>
    %200 = vector.broadcast %199 : vector<1x128xf32> to vector<8x128xf32>
    %201 = arith.addf %197, %200 : vector<8x128xf32>
    %202 = math.tanh %201 : vector<8x128xf32>
    %203 = arith.addf %165, %202 : vector<8x128xf32>
    %c7 = arith.constant 7 : index
    %c0_140 = arith.constant 0 : index
    %c0_141 = arith.constant 0 : index
    %204 = vector.load %arg1[%c7, %c0_140, %c0_141] : memref<8x8x128xf32, #tpu.memory_space<vmem>>, vector<1x8x128xf32>
    %205 = vector.shape_cast %204 : vector<1x8x128xf32> to vector<8x128xf32>
    %206 = arith.truncf %172 : vector<8x128xf32> to vector<8x128xbf16>
    %c0_142 = arith.constant 0 : index
    %c0_143 = arith.constant 0 : index
    %207 = vector.load %arg2[%c0_142, %c0_143] : memref<128x128xbf16, #tpu.memory_space<vmem>>, vector<128x128xbf16>
    %cst_144 = arith.constant dense<0.000000e+00> : vector<8x128xf32>
    %208 = tpu.matmul %206, %207, %cst_144 {dimension_numbers = #tpu.dot_dimension_numbers<[1], [0], [0], [1], [0, 0, 1, 1], [], []>} : vector<8x128xbf16>, vector<128x128xbf16>, vector<8x128xf32> -> vector<8x128xf32>
    %209 = arith.addf %205, %208 : vector<8x128xf32>
    %210 = math.tanh %209 : vector<8x128xf32>
    %211 = tpu.concatenate %172, %182 in 1 : vector<8x128xf32>, vector<8x128xf32> -> vector<8x256xf32>
    %212 = arith.truncf %211 : vector<8x256xf32> to vector<8x256xbf16>
    %c0_145 = arith.constant 0 : index
    %c0_146 = arith.constant 0 : index
    %c0_147 = arith.constant 0 : index
    %213 = vector.load %arg3[%c0_145, %c0_146, %c0_147] : memref<3x256x128xbf16, #tpu.memory_space<vmem>>, vector<1x256x128xbf16>
    %214 = vector.shape_cast %213 : vector<1x256x128xbf16> to vector<256x128xbf16>
    %cst_148 = arith.constant dense<0.000000e+00> : vector<8x128xf32>
    %215 = tpu.matmul %212, %214, %cst_148 {dimension_numbers = #tpu.dot_dimension_numbers<[1], [0], [0], [1], [0, 0, 1, 1], [], []>} : vector<8x256xbf16>, vector<256x128xbf16>, vector<8x128xf32> -> vector<8x128xf32>
    %c0_149 = arith.constant 0 : index
    %c0_150 = arith.constant 0 : index
    %c0_151 = arith.constant 0 : index
    %216 = vector.load %arg4[%c0_149, %c0_150, %c0_151] : memref<3x1x128xf32, #tpu.memory_space<vmem>>, vector<1x1x128xf32>
    %217 = vector.shape_cast %216 : vector<1x1x128xf32> to vector<1x128xf32>
    %218 = vector.broadcast %217 : vector<1x128xf32> to vector<8x128xf32>
    %219 = arith.addf %215, %218 : vector<8x128xf32>
    %220 = math.tanh %219 : vector<8x128xf32>
    %221 = tpu.concatenate %182, %192 in 1 : vector<8x128xf32>, vector<8x128xf32> -> vector<8x256xf32>
    %222 = arith.truncf %221 : vector<8x256xf32> to vector<8x256xbf16>
    %c1_152 = arith.constant 1 : index
    %c0_153 = arith.constant 0 : index
    %c0_154 = arith.constant 0 : index
    %223 = vector.load %arg3[%c1_152, %c0_153, %c0_154] : memref<3x256x128xbf16, #tpu.memory_space<vmem>>, vector<1x256x128xbf16>
    %224 = vector.shape_cast %223 : vector<1x256x128xbf16> to vector<256x128xbf16>
    %cst_155 = arith.constant dense<0.000000e+00> : vector<8x128xf32>
    %225 = tpu.matmul %222, %224, %cst_155 {dimension_numbers = #tpu.dot_dimension_numbers<[1], [0], [0], [1], [0, 0, 1, 1], [], []>} : vector<8x256xbf16>, vector<256x128xbf16>, vector<8x128xf32> -> vector<8x128xf32>
    %c1_156 = arith.constant 1 : index
    %c0_157 = arith.constant 0 : index
    %c0_158 = arith.constant 0 : index
    %226 = vector.load %arg4[%c1_156, %c0_157, %c0_158] : memref<3x1x128xf32, #tpu.memory_space<vmem>>, vector<1x1x128xf32>
    %227 = vector.shape_cast %226 : vector<1x1x128xf32> to vector<1x128xf32>
    %228 = vector.broadcast %227 : vector<1x128xf32> to vector<8x128xf32>
    %229 = arith.addf %225, %228 : vector<8x128xf32>
    %230 = math.tanh %229 : vector<8x128xf32>
    %231 = tpu.concatenate %192, %202 in 1 : vector<8x128xf32>, vector<8x128xf32> -> vector<8x256xf32>
    %232 = arith.truncf %231 : vector<8x256xf32> to vector<8x256xbf16>
    %c2_159 = arith.constant 2 : index
    %c0_160 = arith.constant 0 : index
    %c0_161 = arith.constant 0 : index
    %233 = vector.load %arg3[%c2_159, %c0_160, %c0_161] : memref<3x256x128xbf16, #tpu.memory_space<vmem>>, vector<1x256x128xbf16>
    %234 = vector.shape_cast %233 : vector<1x256x128xbf16> to vector<256x128xbf16>
    %cst_162 = arith.constant dense<0.000000e+00> : vector<8x128xf32>
    %235 = tpu.matmul %232, %234, %cst_162 {dimension_numbers = #tpu.dot_dimension_numbers<[1], [0], [0], [1], [0, 0, 1, 1], [], []>} : vector<8x256xbf16>, vector<256x128xbf16>, vector<8x128xf32> -> vector<8x128xf32>
    %c2_163 = arith.constant 2 : index
    %c0_164 = arith.constant 0 : index
    %c0_165 = arith.constant 0 : index
    %236 = vector.load %arg4[%c2_163, %c0_164, %c0_165] : memref<3x1x128xf32, #tpu.memory_space<vmem>>, vector<1x1x128xf32>
    %237 = vector.shape_cast %236 : vector<1x1x128xf32> to vector<1x128xf32>
    %238 = vector.broadcast %237 : vector<1x128xf32> to vector<8x128xf32>
    %239 = arith.addf %235, %238 : vector<8x128xf32>
    %240 = math.tanh %239 : vector<8x128xf32>
    %241 = arith.addf %203, %240 : vector<8x128xf32>
    %242 = tpu.concatenate %210, %220 in 1 : vector<8x128xf32>, vector<8x128xf32> -> vector<8x256xf32>
    %243 = arith.truncf %242 : vector<8x256xf32> to vector<8x256xbf16>
    %c0_166 = arith.constant 0 : index
    %c0_167 = arith.constant 0 : index
    %c0_168 = arith.constant 0 : index
    %244 = vector.load %arg3[%c0_166, %c0_167, %c0_168] : memref<3x256x128xbf16, #tpu.memory_space<vmem>>, vector<1x256x128xbf16>
    %245 = vector.shape_cast %244 : vector<1x256x128xbf16> to vector<256x128xbf16>
    %cst_169 = arith.constant dense<0.000000e+00> : vector<8x128xf32>
    %246 = tpu.matmul %243, %245, %cst_169 {dimension_numbers = #tpu.dot_dimension_numbers<[1], [0], [0], [1], [0, 0, 1, 1], [], []>} : vector<8x256xbf16>, vector<256x128xbf16>, vector<8x128xf32> -> vector<8x128xf32>
    %c0_170 = arith.constant 0 : index
    %c0_171 = arith.constant 0 : index
    %c0_172 = arith.constant 0 : index
    %247 = vector.load %arg4[%c0_170, %c0_171, %c0_172] : memref<3x1x128xf32, #tpu.memory_space<vmem>>, vector<1x1x128xf32>
    %248 = vector.shape_cast %247 : vector<1x1x128xf32> to vector<1x128xf32>
    %249 = vector.broadcast %248 : vector<1x128xf32> to vector<8x128xf32>
    %250 = arith.addf %246, %249 : vector<8x128xf32>
    %251 = math.tanh %250 : vector<8x128xf32>
    %252 = tpu.concatenate %220, %230 in 1 : vector<8x128xf32>, vector<8x128xf32> -> vector<8x256xf32>
    %253 = arith.truncf %252 : vector<8x256xf32> to vector<8x256xbf16>
    %c1_173 = arith.constant 1 : index
    %c0_174 = arith.constant 0 : index
    %c0_175 = arith.constant 0 : index
    %254 = vector.load %arg3[%c1_173, %c0_174, %c0_175] : memref<3x256x128xbf16, #tpu.memory_space<vmem>>, vector<1x256x128xbf16>
    %255 = vector.shape_cast %254 : vector<1x256x128xbf16> to vector<256x128xbf16>
    %cst_176 = arith.constant dense<0.000000e+00> : vector<8x128xf32>
    %256 = tpu.matmul %253, %255, %cst_176 {dimension_numbers = #tpu.dot_dimension_numbers<[1], [0], [0], [1], [0, 0, 1, 1], [], []>} : vector<8x256xbf16>, vector<256x128xbf16>, vector<8x128xf32> -> vector<8x128xf32>
    %c1_177 = arith.constant 1 : index
    %c0_178 = arith.constant 0 : index
    %c0_179 = arith.constant 0 : index
    %257 = vector.load %arg4[%c1_177, %c0_178, %c0_179] : memref<3x1x128xf32, #tpu.memory_space<vmem>>, vector<1x1x128xf32>
    %258 = vector.shape_cast %257 : vector<1x1x128xf32> to vector<1x128xf32>
    %259 = vector.broadcast %258 : vector<1x128xf32> to vector<8x128xf32>
    %260 = arith.addf %256, %259 : vector<8x128xf32>
    %261 = math.tanh %260 : vector<8x128xf32>
    %262 = tpu.concatenate %230, %240 in 1 : vector<8x128xf32>, vector<8x128xf32> -> vector<8x256xf32>
    %263 = arith.truncf %262 : vector<8x256xf32> to vector<8x256xbf16>
    %c2_180 = arith.constant 2 : index
    %c0_181 = arith.constant 0 : index
    %c0_182 = arith.constant 0 : index
    %264 = vector.load %arg3[%c2_180, %c0_181, %c0_182] : memref<3x256x128xbf16, #tpu.memory_space<vmem>>, vector<1x256x128xbf16>
    %265 = vector.shape_cast %264 : vector<1x256x128xbf16> to vector<256x128xbf16>
    %cst_183 = arith.constant dense<0.000000e+00> : vector<8x128xf32>
    %266 = tpu.matmul %263, %265, %cst_183 {dimension_numbers = #tpu.dot_dimension_numbers<[1], [0], [0], [1], [0, 0, 1, 1], [], []>} : vector<8x256xbf16>, vector<256x128xbf16>, vector<8x128xf32> -> vector<8x128xf32>
    %c2_184 = arith.constant 2 : index
    %c0_185 = arith.constant 0 : index
    %c0_186 = arith.constant 0 : index
    %267 = vector.load %arg4[%c2_184, %c0_185, %c0_186] : memref<3x1x128xf32, #tpu.memory_space<vmem>>, vector<1x1x128xf32>
    %268 = vector.shape_cast %267 : vector<1x1x128xf32> to vector<1x128xf32>
    %269 = vector.broadcast %268 : vector<1x128xf32> to vector<8x128xf32>
    %270 = arith.addf %266, %269 : vector<8x128xf32>
    %271 = math.tanh %270 : vector<8x128xf32>
    %272 = arith.addf %241, %271 : vector<8x128xf32>
    %273 = tpu.concatenate %251, %261 in 1 : vector<8x128xf32>, vector<8x128xf32> -> vector<8x256xf32>
    %274 = arith.truncf %273 : vector<8x256xf32> to vector<8x256xbf16>
    %c1_187 = arith.constant 1 : index
    %c0_188 = arith.constant 0 : index
    %c0_189 = arith.constant 0 : index
    %275 = vector.load %arg3[%c1_187, %c0_188, %c0_189] : memref<3x256x128xbf16, #tpu.memory_space<vmem>>, vector<1x256x128xbf16>
    %276 = vector.shape_cast %275 : vector<1x256x128xbf16> to vector<256x128xbf16>
    %cst_190 = arith.constant dense<0.000000e+00> : vector<8x128xf32>
    %277 = tpu.matmul %274, %276, %cst_190 {dimension_numbers = #tpu.dot_dimension_numbers<[1], [0], [0], [1], [0, 0, 1, 1], [], []>} : vector<8x256xbf16>, vector<256x128xbf16>, vector<8x128xf32> -> vector<8x128xf32>
    %c1_191 = arith.constant 1 : index
    %c0_192 = arith.constant 0 : index
    %c0_193 = arith.constant 0 : index
    %278 = vector.load %arg4[%c1_191, %c0_192, %c0_193] : memref<3x1x128xf32, #tpu.memory_space<vmem>>, vector<1x1x128xf32>
    %279 = vector.shape_cast %278 : vector<1x1x128xf32> to vector<1x128xf32>
    %280 = vector.broadcast %279 : vector<1x128xf32> to vector<8x128xf32>
    %281 = arith.addf %277, %280 : vector<8x128xf32>
    %282 = math.tanh %281 : vector<8x128xf32>
    %283 = tpu.concatenate %261, %271 in 1 : vector<8x128xf32>, vector<8x128xf32> -> vector<8x256xf32>
    %284 = arith.truncf %283 : vector<8x256xf32> to vector<8x256xbf16>
    %c2_194 = arith.constant 2 : index
    %c0_195 = arith.constant 0 : index
    %c0_196 = arith.constant 0 : index
    %285 = vector.load %arg3[%c2_194, %c0_195, %c0_196] : memref<3x256x128xbf16, #tpu.memory_space<vmem>>, vector<1x256x128xbf16>
    %286 = vector.shape_cast %285 : vector<1x256x128xbf16> to vector<256x128xbf16>
    %cst_197 = arith.constant dense<0.000000e+00> : vector<8x128xf32>
    %287 = tpu.matmul %284, %286, %cst_197 {dimension_numbers = #tpu.dot_dimension_numbers<[1], [0], [0], [1], [0, 0, 1, 1], [], []>} : vector<8x256xbf16>, vector<256x128xbf16>, vector<8x128xf32> -> vector<8x128xf32>
    %c2_198 = arith.constant 2 : index
    %c0_199 = arith.constant 0 : index
    %c0_200 = arith.constant 0 : index
    %288 = vector.load %arg4[%c2_198, %c0_199, %c0_200] : memref<3x1x128xf32, #tpu.memory_space<vmem>>, vector<1x1x128xf32>
    %289 = vector.shape_cast %288 : vector<1x1x128xf32> to vector<1x128xf32>
    %290 = vector.broadcast %289 : vector<1x128xf32> to vector<8x128xf32>
    %291 = arith.addf %287, %290 : vector<8x128xf32>
    %292 = math.tanh %291 : vector<8x128xf32>
    %293 = arith.addf %272, %292 : vector<8x128xf32>
    %294 = tpu.concatenate %282, %292 in 1 : vector<8x128xf32>, vector<8x128xf32> -> vector<8x256xf32>
    %295 = arith.truncf %294 : vector<8x256xf32> to vector<8x256xbf16>
    %c2_201 = arith.constant 2 : index
    %c0_202 = arith.constant 0 : index
    %c0_203 = arith.constant 0 : index
    %296 = vector.load %arg3[%c2_201, %c0_202, %c0_203] : memref<3x256x128xbf16, #tpu.memory_space<vmem>>, vector<1x256x128xbf16>
    %297 = vector.shape_cast %296 : vector<1x256x128xbf16> to vector<256x128xbf16>
    %cst_204 = arith.constant dense<0.000000e+00> : vector<8x128xf32>
    %298 = tpu.matmul %295, %297, %cst_204 {dimension_numbers = #tpu.dot_dimension_numbers<[1], [0], [0], [1], [0, 0, 1, 1], [], []>} : vector<8x256xbf16>, vector<256x128xbf16>, vector<8x128xf32> -> vector<8x128xf32>
    %c2_205 = arith.constant 2 : index
    %c0_206 = arith.constant 0 : index
    %c0_207 = arith.constant 0 : index
    %299 = vector.load %arg4[%c2_205, %c0_206, %c0_207] : memref<3x1x128xf32, #tpu.memory_space<vmem>>, vector<1x1x128xf32>
    %300 = vector.shape_cast %299 : vector<1x1x128xf32> to vector<1x128xf32>
    %301 = vector.broadcast %300 : vector<1x128xf32> to vector<8x128xf32>
    %302 = arith.addf %298, %301 : vector<8x128xf32>
    %303 = math.tanh %302 : vector<8x128xf32>
    %304 = arith.addf %293, %303 : vector<8x128xf32>
    %cst_208 = arith.constant 1.250000e-01 : f32
    %305 = vector.broadcast %cst_208 : f32 to vector<8x128xf32>
    %306 = arith.mulf %304, %305 : vector<8x128xf32>
    %307 = arith.truncf %306 : vector<8x128xf32> to vector<8x128xbf16>
    %c0_209 = arith.constant 0 : index
    %c0_210 = arith.constant 0 : index
    %308 = vector.load %arg5[%c0_209, %c0_210] : memref<128x128xbf16, #tpu.memory_space<vmem>>, vector<128x128xbf16>
    %cst_211 = arith.constant dense<0.000000e+00> : vector<8x128xf32>
    %309 = tpu.matmul %307, %308, %cst_211 {dimension_numbers = #tpu.dot_dimension_numbers<[1], [0], [0], [1], [0, 0, 1, 1], [], []>} : vector<8x128xbf16>, vector<128x128xbf16>, vector<8x128xf32> -> vector<8x128xf32>
    %c0_212 = arith.constant 0 : index
    %c0_213 = arith.constant 0 : index
    %310 = vector.load %arg6[%c0_212, %c0_213] : memref<1x128xf32, #tpu.memory_space<vmem>>, vector<1x128xf32>
    %311 = vector.broadcast %310 : vector<1x128xf32> to vector<8x128xf32>
    %312 = arith.addf %309, %311 : vector<8x128xf32>
    %c0_214 = arith.constant 0 : index
    %c0_215 = arith.constant 0 : index
    %313 = vector.load %arg7[%c0_214, %c0_215] : memref<8x128xf32, #tpu.memory_space<vmem>>, vector<8x128xf32>
    tpu.vector_store %arg7[%c0_214, %c0_215], %312 {strides = array<i32>} : memref<8x128xf32, #tpu.memory_space<vmem>>, vector<8x128xf32>,
    return
  }
  func.func @transform_0(%arg0: i32) -> (i32, i32, i32) {
    %c0_i32 = arith.constant 0 : i32
    %c0_i32_0 = arith.constant 0 : i32
    %c0_i32_1 = arith.constant 0 : i32
    return %c0_i32, %arg0, %c0_i32_0 : i32, i32, i32
  }
  func.func @transform_1(%arg0: i32) -> (i32, i32) {
    %c0_i32 = arith.constant 0 : i32
    %c0_i32_0 = arith.constant 0 : i32
    %c0_i32_1 = arith.constant 0 : i32
    return %c0_i32, %c0_i32_0 : i32, i32
  }
  func.func @transform_2(%arg0: i32) -> (i32, i32, i32) {
    %c0_i32 = arith.constant 0 : i32
    %c0_i32_0 = arith.constant 0 : i32
    %c0_i32_1 = arith.constant 0 : i32
    %c0_i32_2 = arith.constant 0 : i32
    return %c0_i32, %c0_i32_0, %c0_i32_1 : i32, i32, i32
  }
  func.func @transform_3(%arg0: i32) -> (i32, i32, i32) {
    %c0_i32 = arith.constant 0 : i32
    %c0_i32_0 = arith.constant 0 : i32
    %c0_i32_1 = arith.constant 0 : i32
    %c0_i32_2 = arith.constant 0 : i32
    return %c0_i32, %c0_i32_0, %c0_i32_1 : i32, i32, i32
  }
  func.func @transform_4(%arg0: i32) -> (i32, i32) {
    %c0_i32 = arith.constant 0 : i32
    %c0_i32_0 = arith.constant 0 : i32
    %c0_i32_1 = arith.constant 0 : i32
    return %c0_i32, %c0_i32_0 : i32, i32
  }
  func.func @transform_5(%arg0: i32) -> (i32, i32) {
    %c0_i32 = arith.constant 0 : i32
    %c0_i32_0 = arith.constant 0 : i32
    %c0_i32_1 = arith.constant 0 : i32
    return %c0_i32, %c0_i32_0 : i32, i32
  }
  func.func @transform_6(%arg0: i32) -> (i32, i32) {
    %c0_i32 = arith.constant 0 : i32
    %c0_i32_0 = arith.constant 0 : i32
    return %arg0, %c0_i32 : i32, i32
  }
}

</mosaic_0001>

<bundles_post_ra>
// kernel: tpu_custom_call.1
= control target key start
LH: loop header
LB: loop body
LE: loop exit
PB: predicated region body
PF: predicated region fallthrough
CT: control target
= control target key end

     0   :  { %11 = vsyncpa [#allocation3], 0  ;;  %s4135_s0 = inlined_call_operand.hbm [shape: f32[8,8,128], index: 0, kind: input, shape index: {}]   ;;  %s4136_s1 = inlined_call_operand.hbm [shape: bf16[128,128], index: 1, kind: input, shape index: {}]   ;;  %s4137_s2 = inlined_call_operand.hbm [shape: bf16[3,256,128], index: 2, kind: input, shape index: {}]   ;;  %s4138_s3 = inlined_call_operand.vmem [shape: f32[3,1,128], index: 3, kind: input, shape index: {}]   ;;  %s4139_s4 = inlined_call_operand.hbm [shape: bf16[128,128], index: 4, kind: input, shape index: {}]   ;;  %s4140_s5 = inlined_call_operand.vmem [shape: f32[1,128], index: 5, kind: input, shape index: {}]   ;;  %s4141_s6 = inlined_call_operand.hbm [shape: f32[8,128], index: 6, kind: output, shape index: {}]  }
   0x1   :  { %12 = vsyncpa [#allocation6], 0 }
   0x2   :  { %13 = vsyncpa [#allocation9], 0 }
   0x3   :  { %14 = vsyncpa [#allocation4], 0  ;;  %s3226_s21 = smov [#allocation5]  }
   0x4   :  { %s32_s22 = sshll.u32 %s3226_s21, 4  ;;  %s33_s22 = int_to_ptr.vmem [resolvable:$true] %s32_s22 }
   0x5   :  { %s3126_s23 = scalar_lea.vmem %s33_s22, 1024  ;;  %p3131_p1 = scmp.lt.s32.totalorder %s33_s22, %s33_s22 }
   0x6   :  { %p3127_p0 = scmp.ne.s32.totalorder %s33_s22, %s3126_s23  ;;  %p3132_p2 = scmp.lt.s32.totalorder %s3126_s23, %s3126_s23 }
   0x8   :  { %p3133_p3 = por %p3132_p2, %p3131_p1 }
   0xa   :  { %p3134_p4 = pnand %p3133_p3, %p3127_p0 }
   0xc   :  { %3137 = shalt.err (!%p3134_p4)
}
   0xd   :  { %s3227_s24 = smov 64   ;;  %s3228_s25 = smov 4  }
   0xe   :  { %38 = dma.hbm_to_vmem [thread:$0]  %s4136_s1, 1024, %s33_s22, [#allocation6], %s3227_s24, %s3227_s24, %s3228_s25  }
   0xf   :  { %s3229_s28 = smov [#allocation2]  }
  0x10   :  { %s20_s29 = sshll.u32 %s3229_s28, 4  ;;  %s21_s29 = int_to_ptr.vmem [resolvable:$true] %s20_s29 }
  0x11   :  { %s3146_s30 = scalar_lea.vmem %s21_s29, 1024  ;;  %p3151_p6 = scmp.lt.s32.totalorder %s21_s29, %s21_s29 }
  0x12   :  { %p3147_p5 = scmp.ne.s32.totalorder %s21_s29, %s3146_s30  ;;  %p3152_p7 = scmp.lt.s32.totalorder %s3146_s30, %s3146_s30 }
  0x14   :  { %p3153_p8 = por %p3152_p7, %p3151_p6 }
  0x16   :  { %p3154_p9 = pnand %p3153_p8, %p3147_p5 }
  0x18   :  { %3157 = shalt.err (!%p3154_p9)
}
  0x19   :  { %s3230_s7 = smov 128   ;;  %s3231_s8 = smov 8  }
  0x1a   :  { %26 = dma.hbm_to_vmem [thread:$0]  %s4135_s0, 1024, %s21_s29, [#allocation3], %s3230_s7, %s3230_s7, %s3231_s8  }
  0x1b   :  { %s3232_s11 = smov [#allocation7]   ;;  %s3233_s13 = smov [#allocation8]  }
  0x1c   :  { %s44_s12 = sshll.u32 %s3232_s11, 4  ;;  %s58_s1 = sshll.u32 %s3233_s13, 4  ;;  %s45_s12 = int_to_ptr.vmem [resolvable:$true] %s44_s12  ;;  %s59_s1 = int_to_ptr.vmem [resolvable:$true] %s58_s1 }
  0x1d   :  { %s3166_s14 = scalar_lea.vmem %s45_s12, 6144  ;;  %p3171_p11 = scmp.lt.s32.totalorder %s45_s12, %s45_s12 }
  0x1e   :  { %p3167_p10 = scmp.ne.s32.totalorder %s45_s12, %s3166_s14  ;;  %p3172_p12 = scmp.lt.s32.totalorder %s3166_s14, %s3166_s14 }
  0x20   :  { %p3173_p13 = por %p3172_p12, %p3171_p11 }
  0x22   :  { %p3174_p0 = pnand %p3173_p13, %p3167_p10 }
  0x24   :  { %3177 = shalt.err (!%p3174_p0)
}
  0x25   :  { %50 = dma.hbm_to_vmem [thread:$0]  %s4137_s2, 6144, %s45_s12, [#allocation6], %s3227_s24, %s3227_s24, %s3228_s25  }
  0x26   :  { %s3186_s0 = scalar_lea.vmem %s59_s1, 1024  ;;  %p3191_p2 = scmp.lt.s32.totalorder %s59_s1, %s59_s1 }
  0x27   :  { %p3187_p1 = scmp.ne.s32.totalorder %s59_s1, %s3186_s0  ;;  %p3192_p3 = scmp.lt.s32.totalorder %s3186_s0, %s3186_s0 }
  0x29   :  { %p3193_p4 = por %p3192_p3, %p3191_p2 }
  0x2b   :  { %p3194_p5 = pnand %p3193_p4, %p3187_p1 }
  0x2d   :  { %3197 = shalt.err (!%p3194_p5)
}
  0x2e   :  { %64 = dma.hbm_to_vmem [thread:$0]  %s4139_s4, 1024, %s59_s1, [#allocation9], %s3227_s24, %s3227_s24, %s3228_s25  }
  0x2f   :  { %3218 = dma.done.wait [#allocation3], 1024  }
  0x30   :  { %3219 = vsyncadd [#allocation3], 4294966272 }
  0x31   :  { %3220 = dma.done.wait [#allocation6], 7168  }
  0x32   :  { %3221 = vsyncadd [#allocation6], 4294960128 }
  0x33   :  { %3222 = dma.done.wait [#allocation9], 1024  }
  0x34   :  { %3223 = vsyncadd [#allocation9], 4294966272  ;;  %v4142_v0 = vmov 0.0   ;;  %vm3235_vm0 = vmmov 0   ;;  %v3301_v1 = vld [vmem:[#allocation5 + $0x38] sm:$0xff]   ;;  %v3304_v2 = vld [vmem:[#allocation5 + $0x30] sm:$0xff]  }
  0x35   :  { %2738 = vmatprep.subr.bf16.mxu0 %v4142_v0  ;;  %2754 = vmatprep.mubr.msk.bf16.mxu0 %vm3235_vm0, %v4142_v0  ;;  %v3310_v3 = vld [vmem:[#allocation5 + $0x28] sm:$0xff]   ;;  %v3316_v4 = vld [vmem:[#allocation5 + $0x20] sm:$0xff]   ;;  %v3322_v5 = vld [vmem:[#allocation5 + $0x18] sm:$0xff]   ;;  %v3236_v13 = vmov 0   ;;  %v3237_v23 = vmov 0.0|0.0   ;;  %s3238_s30 = smov [#allocation10]  }
  0x36   :  { %2758 = vmatprep.subr.bf16.mxu1 %v4142_v0  ;;  %2774 = vmatprep.mubr.msk.bf16.mxu1 %vm3235_vm0, %v4142_v0  ;;  %v3327_v6 = vld [vmem:[#allocation5 + $0x10] sm:$0xff]   ;;  %v3333_v7 = vld [vmem:[#allocation5 + $0x8] sm:$0xff]   ;;  %v3339_v8 = vld [vmem:[#allocation5] sm:$0xff]   ;;  %s2048_s7 = sshll.u32 %s3238_s30, 4  ;;  %s2049_s7 = int_to_ptr.vmem [resolvable:$true] %s2048_s7 }
  0x37   :  { %2739 = vmatpush3.bf16.msra.mxu0 %v3301_v1  ;;  %2759 = vmatpush3.bf16.msra.mxu1 %v3301_v1  ;;  %4154 = vst [vmem:[#allocation15_spill] sm:$0xff] %v3339_v8  ;;  %v3341_v9 = vld [vmem:[#allocation7 + $0x78] sm:$0xff]   ;;  %v3349_v11 = vld [vmem:[#allocation7 + $0x70] sm:$0xff]   ;;  %v3357_v14 = vld [vmem:[#allocation7 + $0x68] sm:$0xff]   ;;  %s3198_s8 = scalar_lea.vmem %s2049_s7, 128  ;;  %p3203_p7 = scmp.lt.s32.totalorder %s2049_s7, %s2049_s7 }
  0x38   :  { %2740 = vmatprep.subr.bf16.mxu0 %v4142_v0  ;;  %2760 = vmatprep.subr.bf16.mxu1 %v4142_v0  ;;  %v3347_v10 = vld [vmem:[#allocation7 + $0x38] sm:$0xff]   ;;  %v3355_v12 = vld [vmem:[#allocation7 + $0x30] sm:$0xff]   ;;  %v3361_v15 = vld [vmem:[#allocation7 + $0x28] sm:$0xff]   ;;  %p3199_p6 = scmp.ne.s32.totalorder %s2049_s7, %s3198_s8  ;;  %p3204_p8 = scmp.lt.s32.totalorder %s3198_s8, %s3198_s8 }
  0x39   :  { %v3363_v16 = vld [vmem:[#allocation7 + $0x60] sm:$0xff]   ;;  %v3372_v18 = vld [vmem:[#allocation7 + $0x58] sm:$0xff]   ;;  %v3378_v20 = vld [vmem:[#allocation7 + $0x50] sm:$0xff]  }
  0x3a   :  { %v3369_v17 = vld [vmem:[#allocation7 + $0x20] sm:$0xff]   ;;  %v3374_v19 = vld [vmem:[#allocation7 + $0x18] sm:$0xff]   ;;  %v3380_v21 = vld [vmem:[#allocation7 + $0x10] sm:$0xff]   ;;  %p3205_p9 = por %p3204_p8, %p3203_p7 }
  0x3b   :  { %2741 = vmatpush3.bf16.msra.mxu0 %v3304_v2  ;;  %2761 = vmatpush3.bf16.msra.mxu1 %v3304_v2  ;;  %v3382_v22 = vld [vmem:[#allocation7 + $0x48] sm:$0xff]   ;;  %v3390_v25 = vld [vmem:[#allocation7 + $0x40] sm:$0xff]   ;;  %v3431_v35 = vld [vmem:[#allocation7 + $0xf8] sm:$0xff]  }
  0x3c   :  { %2742 = vmatprep.subr.bf16.mxu0 %v4142_v0  ;;  %2762 = vmatprep.subr.bf16.mxu1 %v4142_v0  ;;  %4155 = vst [vmem:[#allocation16_spill] sm:$0xff] %v3382_v22  ;;  %v3387_v24 = vld [vmem:[#allocation7 + $0x8] sm:$0xff]   ;;  %4157 = vst [vmem:[#allocation18_spill] sm:$0xff] %v3390_v25  ;;  %v3393_v26 = vld [vmem:[#allocation7] sm:$0xff]   ;;  %p3206_p10 = pnand %p3205_p9, %p3199_p6 }
  0x3d   :  { %4156 = vst [vmem:[#allocation17_spill] sm:$0xff] %v3387_v24  ;;  %v80_v27 = vld [vmem:[#allocation2] sm:$0xff]  ;;  %4158 = vst [vmem:[#allocation19_spill] sm:$0xff] %v3431_v35  ;;  %v188_v36 = vld [vmem:[#allocation2 + $0x8] sm:$0xff] }
  0x3e   :  { %v3437_v41 = vld [vmem:[%s4138_s3] ss:$0 sm:$0xff]  ;;  %v3440_v50 = vld [vmem:[#allocation7 + $0xb8] sm:$0xff]   ;;  %v3442_v52 = vld [vmem:[#allocation7 + $0xf0] sm:$0xff]  }
  0x3f   :  { %2743 = vmatpush3.bf16.msra.mxu0 %v3310_v3  ;;  %2763 = vmatpush3.bf16.msra.mxu1 %v3310_v3  ;;  %v3445_v54 = vld [vmem:[#allocation7 + $0xb0] sm:$0xff]   ;;  %v3449_v56 = vld [vmem:[#allocation7 + $0xe8] sm:$0xff]   ;;  %v3455_v58 = vld [vmem:[#allocation7 + $0xe0] sm:$0xff]  }
  0x40   :  { %2744 = vmatprep.subr.bf16.mxu0 %v4142_v0  ;;  %2764 = vmatprep.subr.bf16.mxu1 %v4142_v0  ;;  %v3452_v57 = vld [vmem:[#allocation7 + $0xa8] sm:$0xff]   ;;  %v3462_v59 = vld [vmem:[#allocation7 + $0xa0] sm:$0xff]   ;;  %v3465_v60 = vld [vmem:[#allocation7 + $0xd8] sm:$0xff]  }
  0x41   :  { %v3470_v61 = vld [vmem:[#allocation7 + $0x98] sm:$0xff]   ;;  %v3473_v62 = vld [vmem:[#allocation7 + $0xd0] sm:$0xff]  }
  0x42   :  { %v3478_v63 = vld [vmem:[#allocation7 + $0x90] sm:$0xff]  }
  0x43   :  { %2745 = vmatpush3.bf16.msra.mxu0 %v3316_v4  ;;  %2765 = vmatpush3.bf16.msra.mxu1 %v3316_v4 }
  0x44   :  { %2746 = vmatprep.subr.bf16.mxu0 %v4142_v0  ;;  %2766 = vmatprep.subr.bf16.mxu1 %v4142_v0 }
  0x47   :  { %2747 = vmatpush3.bf16.msra.mxu0 %v3322_v5  ;;  %2767 = vmatpush3.bf16.msra.mxu1 %v3322_v5 }
  0x48   :  { %2748 = vmatprep.subr.bf16.mxu0 %v4142_v0  ;;  %2768 = vmatprep.subr.bf16.mxu1 %v4142_v0 }
  0x4b   :  { %2749 = vmatpush3.bf16.msra.mxu0 %v3327_v6  ;;  %2769 = vmatpush3.bf16.msra.mxu1 %v3327_v6 }
  0x4c   :  { %2750 = vmatprep.subr.bf16.mxu0 %v4142_v0  ;;  %2770 = vmatprep.subr.bf16.mxu1 %v4142_v0 }
  0x4f   :  { %2751 = vmatpush3.bf16.msra.mxu0 %v3333_v7  ;;  %2771 = vmatpush3.bf16.msra.mxu1 %v3333_v7 }
  0x50   :  { %2752 = vmatprep.subr.bf16.mxu0 %v4142_v0  ;;  %2772 = vmatprep.subr.bf16.mxu1 %v4142_v0 }
  0x53   :  { %2753 = vmatpush3.bf16.msra.mxu0 %v3339_v8  ;;  %2773 = vmatpush3.bf16.msra.mxu1 %v3339_v8 }
  0x54   :  { %2147 = vmatprep.subr.bf16.mxu0 %v3341_v9  ;;  %2778 = vmatprep.subr.bf16.mxu1 %v4142_v0 }
  0x56   :  { %2755 = vmatmul.mubr.bf16.vlgmr.msra.gmra.mxu0 %v3236_v13  ;;  %v3481_v13 = vld [vmem:[#allocation7 + $0xc8] sm:$0xff]  }
  0x57   :  { %2148 = vmatpush3.bf16.msra.mxu0 %v3347_v10  ;;  %400 = vmatprep.mubr.bf16.mxu0 %v3237_v23 }
  0x58   :  { %2149 = vmatprep.subr.bf16.mxu0 %v3349_v11 }
  0x5b   :  { %2150 = vmatpush3.bf16.msra.mxu0 %v3355_v12 }
  0x5c   :  { %2151 = vmatprep.subr.bf16.mxu0 %v3357_v14 }
  0x5f   :  { %2152 = vmatpush3.bf16.msra.mxu0 %v3361_v15 }
  0x60   :  { %2153 = vmatprep.subr.bf16.mxu0 %v3363_v16 }
  0x63   :  { %2154 = vmatpush3.bf16.msra.mxu0 %v3369_v17 }
  0x64   :  { %2155 = vmatprep.subr.bf16.mxu0 %v3372_v18 }
  0x67   :  { %2156 = vmatpush3.bf16.msra.mxu0 %v3374_v19 }
  0x68   :  { %2157 = vmatprep.subr.bf16.mxu0 %v3378_v20 }
  0x6b   :  { %2158 = vmatpush3.bf16.msra.mxu0 %v3380_v21 }
  0x6c   :  { %2159 = vmatprep.subr.bf16.mxu0 %v3382_v22 }
  0x6f   :  { %2160 = vmatpush3.bf16.msra.mxu0 %v3387_v24 }
  0x70   :  { %2161 = vmatprep.subr.bf16.mxu0 %v3390_v25 }
  0x73   :  { %2162 = vmatpush3.bf16.msra.mxu0 %v3393_v26 }
  0x74   :  { %2178 = vmatprep.subr.bf16.mxu0 %v3341_v9 }
 0x116   :  { %v179_v28 = vpop.f32.mrf.mxu0 }
 0x117   :  { %v185_v29 = vadd.f32 %v179_v28, %v80_v27  ;;  %v3486_v27 = vld [vmem:[#allocation7 + $0x88] sm:$0xff]   ;;  %v3489_v28 = vld [vmem:[#allocation7 + $0xc0] sm:$0xff]  }
 0x118   :  { %v2756_v30 = vpop.f32.mrf.mxu0 }
 0x119   :  { %2995 = vtanh.f32 %v185_v29  ;;  %v3494_v29 = vld [vmem:[#allocation7 + $0x80] sm:$0xff]   ;;  %v3520_v30 = vld [vmem:[#allocation7 + $0x178] sm:$0xff]  }
 0x11a   :  { %v182_v31 = vpop.f32.mrf.mxu0 }
 0x11b   :  { %v410_v31 = vld [vmem:[#allocation2 + $0x10] sm:$0xff] }
 0x11c   :  { %v2757_v32 = vpop.f32.mrf.mxu0 }
 0x126   :  { %v2996_v33 = vpop.eup %2995 }
 0x127   :  { %v189_v34 = vpack.c.bf16 %v2996_v33, %v2996_v33 }
 0x129   :  { %2775 = vmatmul.mubr.bf16.vlgmr.msra.gmra.mxu1 %v189_v34  ;;  %401 = vmatmul.mubr.bf16.vlgmr.msra.gmra.mxu0 %v189_v34 }
 0x12a   :  { %2779 = vmatpush3.bf16.msra.mxu1 %v3301_v1  ;;  %2179 = vmatpush3.bf16.msra.mxu0 %v3347_v10 }
 0x12b   :  { %2780 = vmatprep.subr.bf16.mxu1 %v4142_v0  ;;  %2180 = vmatprep.subr.bf16.mxu0 %v3349_v11 }
 0x12c   :  { %2794 = vmatprep.mubr.msk.bf16.mxu1 %vm3235_vm0, %v4142_v0 }
 0x12e   :  { %2781 = vmatpush3.bf16.msra.mxu1 %v3304_v2  ;;  %2181 = vmatpush3.bf16.msra.mxu0 %v3355_v12 }
 0x12f   :  { %2782 = vmatprep.subr.bf16.mxu1 %v4142_v0  ;;  %2182 = vmatprep.subr.bf16.mxu0 %v3357_v14 }
 0x132   :  { %2783 = vmatpush3.bf16.msra.mxu1 %v3310_v3  ;;  %2183 = vmatpush3.bf16.msra.mxu0 %v3361_v15 }
 0x133   :  { %2784 = vmatprep.subr.bf16.mxu1 %v4142_v0  ;;  %2184 = vmatprep.subr.bf16.mxu0 %v3363_v16 }
 0x136   :  { %2785 = vmatpush3.bf16.msra.mxu1 %v3316_v4  ;;  %2185 = vmatpush3.bf16.msra.mxu0 %v3369_v17 }
 0x137   :  { %2786 = vmatprep.subr.bf16.mxu1 %v4142_v0  ;;  %2186 = vmatprep.subr.bf16.mxu0 %v3372_v18 }
 0x13a   :  { %2787 = vmatpush3.bf16.msra.mxu1 %v3322_v5  ;;  %2187 = vmatpush3.bf16.msra.mxu0 %v3374_v19 }
 0x13b   :  { %2788 = vmatprep.subr.bf16.mxu1 %v4142_v0  ;;  %2188 = vmatprep.subr.bf16.mxu0 %v3378_v20 }
 0x13e   :  { %2789 = vmatpush3.bf16.msra.mxu1 %v3327_v6  ;;  %2189 = vmatpush3.bf16.msra.mxu0 %v3380_v21 }
 0x13f   :  { %2790 = vmatprep.subr.bf16.mxu1 %v4142_v0  ;;  %2190 = vmatprep.subr.bf16.mxu0 %v3382_v22 }
 0x142   :  { %2791 = vmatpush3.bf16.msra.mxu1 %v3333_v7  ;;  %2191 = vmatpush3.bf16.msra.mxu0 %v3387_v24 }
 0x143   :  { %2792 = vmatprep.subr.bf16.mxu1 %v4142_v0  ;;  %2192 = vmatprep.subr.bf16.mxu0 %v3390_v25 }
 0x146   :  { %2793 = vmatpush3.bf16.msra.mxu1 %v3339_v8  ;;  %2193 = vmatpush3.bf16.msra.mxu0 %v3393_v26 }
 0x147   :  { %2798 = vmatprep.subr.bf16.mxu0 %v4142_v0  ;;  %2200 = vmatprep.subr.bf16.mxu1 %v3431_v35 }
 0x1e9   :  { %v224_v37 = vpop.f32.mrf.mxu1  ;;  %v2163_v38 = vpop.f32.mrf.mxu0 }
 0x1ea   :  { %v230_v39 = vadd.f32 %v224_v37, %v188_v36 }
 0x1eb   :  { %v2776_v40 = vpop.f32.mrf.mxu1  ;;  %v2164_v42 = vpop.f32.mrf.mxu0 }
 0x1ec   :  { %2997 = vtanh.f32 %v230_v39  ;;  %v2165_v43 = vadd.f32 %v2164_v42, %v2163_v38 }
 0x1ed   :  { %v227_v44 = vpop.f32.mrf.mxu1  ;;  %v2166_v45 = vpop.f32.mrf.mxu0 }
 0x1ee   :  { %v403_v46 = vadd.f32 %v2165_v43, %v3437_v41 }
 0x1ef   :  { %v2777_v47 = vpop.f32.mrf.mxu1  ;;  %v2167_v48 = vpop.f32.mrf.mxu0 }
 0x1f0   :  { %2999 = vtanh.f32 %v403_v46 }
 0x1f9   :  { %v2998_v49 = vpop.eup %2997 }
 0x1fa   :  { %v411_v51 = vpack.c.bf16 %v2998_v49, %v2998_v49  ;;  %v3528_v49 = vld [vmem:[#allocation7 + $0x138] sm:$0xff]  }
 0x1fc   :  { %2795 = vmatmul.mubr.bf16.vlgmr.msra.gmra.mxu1 %v411_v51 }
 0x1fd   :  { %v3000_v53 = vpop.eup %2999  ;;  %2201 = vmatpush3.bf16.msra.mxu1 %v3440_v50  ;;  %665 = vmatprep.mubr.bf16.mxu1 %v3237_v23 }
 0x1fe   :  { %2202 = vmatprep.subr.bf16.mxu1 %v3442_v52  ;;  %v454_v55 = vpack.c.bf16 %v3000_v53, %v3000_v53  ;;  %v3535_v53 = vld [vmem:[#allocation7 + $0x130] sm:$0xff]  }
 0x200   :  { %487 = vmatprep.mubr.bf16.mxu0 %v454_v55 }
 0x201   :  { %2203 = vmatpush3.bf16.msra.mxu1 %v3445_v54  ;;  %488 = vmatmul.mubr.bf16.vlgmr.msra.gmra.mxu0 %v411_v51  ;;  %v3530_v51 = vld [vmem:[#allocation7 + $0x170] sm:$0xff]  }
 0x202   :  { %2204 = vmatprep.subr.bf16.mxu1 %v3449_v56  ;;  %2799 = vmatpush3.bf16.msra.mxu0 %v3301_v1 }
 0x203   :  { %2800 = vmatprep.subr.bf16.mxu0 %v4142_v0  ;;  %2814 = vmatprep.mubr.msk.bf16.mxu0 %vm3235_vm0, %v4142_v0 }
 0x205   :  { %2205 = vmatpush3.bf16.msra.mxu1 %v3452_v57 }
 0x206   :  { %2206 = vmatprep.subr.bf16.mxu1 %v3455_v58  ;;  %2801 = vmatpush3.bf16.msra.mxu0 %v3304_v2 }
 0x207   :  { %2802 = vmatprep.subr.bf16.mxu0 %v4142_v0 }
 0x209   :  { %2207 = vmatpush3.bf16.msra.mxu1 %v3462_v59 }
 0x20a   :  { %2208 = vmatprep.subr.bf16.mxu1 %v3465_v60  ;;  %2803 = vmatpush3.bf16.msra.mxu0 %v3310_v3 }
 0x20b   :  { %2804 = vmatprep.subr.bf16.mxu0 %v4142_v0 }
 0x20d   :  { %2209 = vmatpush3.bf16.msra.mxu1 %v3470_v61 }
 0x20e   :  { %2210 = vmatprep.subr.bf16.mxu1 %v3473_v62  ;;  %2805 = vmatpush3.bf16.msra.mxu0 %v3316_v4 }
 0x20f   :  { %2806 = vmatprep.subr.bf16.mxu0 %v4142_v0 }
 0x211   :  { %2211 = vmatpush3.bf16.msra.mxu1 %v3478_v63 }
 0x212   :  { %2212 = vmatprep.subr.bf16.mxu1 %v3481_v13  ;;  %2807 = vmatpush3.bf16.msra.mxu0 %v3322_v5 }
 0x213   :  { %2808 = vmatprep.subr.bf16.mxu0 %v4142_v0 }
 0x215   :  { %2213 = vmatpush3.bf16.msra.mxu1 %v3486_v27 }
 0x216   :  { %2214 = vmatprep.subr.bf16.mxu1 %v3489_v28  ;;  %2809 = vmatpush3.bf16.msra.mxu0 %v3327_v6 }
 0x217   :  { %2810 = vmatprep.subr.bf16.mxu0 %v4142_v0 }
 0x219   :  { %2215 = vmatpush3.bf16.msra.mxu1 %v3494_v29 }
 0x21a   :  { %2231 = vmatprep.subr.bf16.mxu1 %v3341_v9  ;;  %2811 = vmatpush3.bf16.msra.mxu0 %v3333_v7 }
 0x21b   :  { %2812 = vmatprep.subr.bf16.mxu0 %v4142_v0 }
 0x21c   :  { %666 = vmatmul.mubr.bf16.vlgmr.msra.gmra.mxu1 %v454_v55  ;;  %v3539_v55 = vld [vmem:[#allocation7 + $0x168] sm:$0xff]  }
 0x21d   :  { %2232 = vmatpush3.bf16.msra.mxu1 %v3347_v10 }
 0x21e   :  { %2233 = vmatprep.subr.bf16.mxu1 %v3349_v11  ;;  %2813 = vmatpush3.bf16.msra.mxu0 %v3339_v8 }
 0x21f   :  { %2253 = vmatprep.subr.bf16.mxu0 %v3431_v35 }
 0x221   :  { %2234 = vmatpush3.bf16.msra.mxu1 %v3355_v12 }
 0x222   :  { %2235 = vmatprep.subr.bf16.mxu1 %v3357_v14 }
 0x225   :  { %2236 = vmatpush3.bf16.msra.mxu1 %v3361_v15 }
 0x226   :  { %2237 = vmatprep.subr.bf16.mxu1 %v3363_v16 }
 0x229   :  { %2238 = vmatpush3.bf16.msra.mxu1 %v3369_v17 }
 0x22a   :  { %2239 = vmatprep.subr.bf16.mxu1 %v3372_v18 }
 0x22d   :  { %2240 = vmatpush3.bf16.msra.mxu1 %v3374_v19 }
 0x22e   :  { %2241 = vmatprep.subr.bf16.mxu1 %v3378_v20 }
 0x231   :  { %2242 = vmatpush3.bf16.msra.mxu1 %v3380_v21 }
 0x232   :  { %2243 = vmatprep.subr.bf16.mxu1 %v3382_v22 }
 0x235   :  { %2244 = vmatpush3.bf16.msra.mxu1 %v3387_v24 }
 0x236   :  { %2245 = vmatprep.subr.bf16.mxu1 %v3390_v25 }
 0x239   :  { %2246 = vmatpush3.bf16.msra.mxu1 %v3393_v26 }
 0x23a   :  { %2275 = vmatprep.subr.bf16.mxu1 %v3520_v30 }
 0x2bc   :  { %v446_v32 = vpop.f32.mrf.mxu1 }
 0x2bd   :  { %v452_v33 = vadd.f32 %v446_v32, %v410_v31  ;;  %v3546_v32 = vld [vmem:[%s4138_s3 + $0x1] ss:$0 sm:$0xff] }
 0x2be   :  { %v2796_v34 = vpop.f32.mrf.mxu1 }
 0x2bf   :  { %3001 = vtanh.f32 %v452_v33  ;;  %v3549_v34 = vld [vmem:[#allocation7 + $0x128] sm:$0xff]  }
 0x2c0   :  { %v449_v36 = vpop.f32.mrf.mxu1 }
 0x2c1   :  { %v2194_v37 = vpop.f32.mrf.mxu0  ;;  %v3552_v36 = vld [vmem:[#allocation7 + $0x160] sm:$0xff]  }
 0x2c2   :  { %v2797_v38 = vpop.f32.mrf.mxu1 }
 0x2c3   :  { %v2195_v39 = vpop.f32.mrf.mxu0 }
 0x2c4   :  { %v2196_v40 = vadd.f32 %v2195_v39, %v2194_v37 }
 0x2c5   :  { %v2197_v42 = vpop.f32.mrf.mxu0 }
 0x2c6   :  { %v490_v43 = vadd.f32 %v2196_v40, %v3437_v41  ;;  %v3558_v40 = vld [vmem:[#allocation7 + $0x120] sm:$0xff]   ;;  %v3561_v42 = vld [vmem:[#allocation7 + $0x158] sm:$0xff]  }
 0x2c7   :  { %v2198_v44 = vpop.f32.mrf.mxu0 }
 0x2c8   :  { %3003 = vtanh.f32 %v490_v43  ;;  %v3566_v43 = vld [vmem:[#allocation7 + $0x118] sm:$0xff]   ;;  %v3569_v44 = vld [vmem:[#allocation7 + $0x150] sm:$0xff]  }
 0x2cc   :  { %v3002_v45 = vpop.eup %3001 }
 0x2cd   :  { %v676_v46 = vpack.c.bf16 %v3002_v45, %v3002_v45  ;;  %v3574_v45 = vld [vmem:[#allocation7 + $0x110] sm:$0xff]  }
 0x2cf   :  { %2815 = vmatmul.mubr.bf16.vlgmr.msra.gmra.mxu0 %v676_v46 }
 0x2d0   :  { %2254 = vmatpush3.bf16.msra.mxu0 %v3440_v50 }
 0x2d1   :  { %2255 = vmatprep.subr.bf16.mxu0 %v3442_v52 }
 0x2d4   :  { %2256 = vmatpush3.bf16.msra.mxu0 %v3445_v54 }
 0x2d5   :  { %v3004_v47 = vpop.eup %3003  ;;  %2257 = vmatprep.subr.bf16.mxu0 %v3449_v56 }
 0x2d6   :  { %v719_v48 = vpack.c.bf16 %v3004_v47, %v3004_v47  ;;  %v3582_v47 = vld [vmem:[#allocation7 + $0x108] sm:$0xff]  }
 0x2d8   :  { %752 = vmatprep.mubr.bf16.mxu1 %v719_v48  ;;  %2258 = vmatpush3.bf16.msra.mxu0 %v3452_v57 }
 0x2d9   :  { %753 = vmatmul.mubr.bf16.vlgmr.msra.gmra.mxu1 %v676_v46  ;;  %2259 = vmatprep.subr.bf16.mxu0 %v3455_v58  ;;  %v3577_v46 = vld [vmem:[#allocation7 + $0x148] sm:$0xff]  }
 0x2da   :  { %2276 = vmatpush3.bf16.msra.mxu1 %v3528_v49  ;;  %972 = vmatprep.mubr.bf16.mxu1 %v3237_v23 }
 0x2db   :  { %2277 = vmatprep.subr.bf16.mxu1 %v3530_v51 }
 0x2dc   :  { %v2216_v31 = vpop.f32.mrf.mxu1  ;;  %2260 = vmatpush3.bf16.msra.mxu0 %v3462_v59 }
 0x2dd   :  { %2261 = vmatprep.subr.bf16.mxu0 %v3465_v60 }
 0x2de   :  { %v2217_v33 = vpop.f32.mrf.mxu1  ;;  %2278 = vmatpush3.bf16.msra.mxu1 %v3535_v53 }
 0x2df   :  { %v2218_v23 = vadd.f32 %v2217_v33, %v2216_v31  ;;  %2279 = vmatprep.subr.bf16.mxu1 %v3539_v55  ;;  %v3585_v31 = vld [vmem:[#allocation7 + $0x140] sm:$0xff]  }
 0x2e0   :  { %v2219_v37 = vpop.f32.mrf.mxu1  ;;  %2262 = vmatpush3.bf16.msra.mxu0 %v3470_v61 }
 0x2e1   :  { %v668_v38 = vadd.f32 %v2218_v23, %v3546_v32  ;;  %2263 = vmatprep.subr.bf16.mxu0 %v3473_v62  ;;  %v3588_v37 = vld [vmem:[#allocation7 + $0x100] sm:$0xff]  }
 0x2e2   :  { %v2220_v39 = vpop.f32.mrf.mxu1  ;;  %2280 = vmatpush3.bf16.msra.mxu1 %v3549_v34 }
 0x2e3   :  { %3005 = vtanh.f32 %v668_v38  ;;  %2281 = vmatprep.subr.bf16.mxu1 %v3552_v36 }
 0x2e4   :  { %2264 = vmatpush3.bf16.msra.mxu0 %v3478_v63 }
 0x2e5   :  { %2265 = vmatprep.subr.bf16.mxu0 %v3481_v13 }
 0x2e6   :  { %2282 = vmatpush3.bf16.msra.mxu1 %v3558_v40 }
 0x2e7   :  { %2283 = vmatprep.subr.bf16.mxu1 %v3561_v42 }
 0x2e8   :  { %2266 = vmatpush3.bf16.msra.mxu0 %v3486_v27 }
 0x2e9   :  { %2267 = vmatprep.subr.bf16.mxu0 %v3489_v28 }
 0x2ea   :  { %2284 = vmatpush3.bf16.msra.mxu1 %v3566_v43 }
 0x2eb   :  { %2285 = vmatprep.subr.bf16.mxu1 %v3569_v44 }
 0x2ec   :  { %2268 = vmatpush3.bf16.msra.mxu0 %v3494_v29 }
 0x2ed   :  { %2818 = vmatprep.subr.bf16.mxu0 %v4142_v0 }
 0x2ee   :  { %2286 = vmatpush3.bf16.msra.mxu1 %v3574_v45 }
 0x2ef   :  { %2287 = vmatprep.subr.bf16.mxu1 %v3577_v46 }
 0x2f0   :  { %v3006_v33 = vpop.eup %3005 }
 0x2f1   :  { %v761_v23 = vpack.c.bf16 %v3006_v33, %v3006_v33 }
 0x2f2   :  { %2288 = vmatpush3.bf16.msra.mxu1 %v3582_v47 }
 0x2f3   :  { %794 = vmatprep.mubr.bf16.mxu0 %v761_v23  ;;  %2289 = vmatprep.subr.bf16.mxu1 %v3585_v31 }
 0x2f4   :  { %795 = vmatmul.mubr.bf16.vlgmr.msra.gmra.mxu0 %v719_v48 }
 0x2f5   :  { %2819 = vmatpush3.bf16.msra.mxu0 %v3301_v1  ;;  %2834 = vmatprep.mubr.msk.bf16.mxu0 %vm3235_vm0, %v4142_v0  ;;  %v675_v1 = vld [vmem:[#allocation2 + $0x18] sm:$0xff] }
 0x2f6   :  { %2290 = vmatpush3.bf16.msra.mxu1 %v3588_v37  ;;  %2820 = vmatprep.subr.bf16.mxu0 %v4142_v0 }
 0x2f7   :  { %2306 = vmatprep.subr.bf16.mxu1 %v3341_v9 }
 0x2f9   :  { %973 = vmatmul.mubr.bf16.vlgmr.msra.gmra.mxu1 %v761_v23  ;;  %2821 = vmatpush3.bf16.msra.mxu0 %v3304_v2 }
 0x2fa   :  { %2822 = vmatprep.subr.bf16.mxu0 %v4142_v0  ;;  %2307 = vmatpush3.bf16.msra.mxu1 %v3347_v10 }
 0x2fb   :  { %2308 = vmatprep.subr.bf16.mxu1 %v3349_v11 }
 0x2fd   :  { %2823 = vmatpush3.bf16.msra.mxu0 %v3310_v3 }
 0x2fe   :  { %2824 = vmatprep.subr.bf16.mxu0 %v4142_v0  ;;  %2309 = vmatpush3.bf16.msra.mxu1 %v3355_v12 }
 0x2ff   :  { %2310 = vmatprep.subr.bf16.mxu1 %v3357_v14 }
 0x301   :  { %2825 = vmatpush3.bf16.msra.mxu0 %v3316_v4 }
 0x302   :  { %2826 = vmatprep.subr.bf16.mxu0 %v4142_v0  ;;  %2311 = vmatpush3.bf16.msra.mxu1 %v3361_v15 }
 0x303   :  { %2312 = vmatprep.subr.bf16.mxu1 %v3363_v16 }
 0x305   :  { %2827 = vmatpush3.bf16.msra.mxu0 %v3322_v5 }
 0x306   :  { %2828 = vmatprep.subr.bf16.mxu0 %v4142_v0  ;;  %2313 = vmatpush3.bf16.msra.mxu1 %v3369_v17 }
 0x307   :  { %2314 = vmatprep.subr.bf16.mxu1 %v3372_v18 }
 0x309   :  { %2829 = vmatpush3.bf16.msra.mxu0 %v3327_v6 }
 0x30a   :  { %2830 = vmatprep.subr.bf16.mxu0 %v4142_v0  ;;  %2315 = vmatpush3.bf16.msra.mxu1 %v3374_v19 }
 0x30b   :  { %2316 = vmatprep.subr.bf16.mxu1 %v3378_v20 }
 0x30d   :  { %2831 = vmatpush3.bf16.msra.mxu0 %v3333_v7 }
 0x30e   :  { %2832 = vmatprep.subr.bf16.mxu0 %v4142_v0  ;;  %2317 = vmatpush3.bf16.msra.mxu1 %v3380_v21 }
 0x30f   :  { %2318 = vmatprep.subr.bf16.mxu1 %v3382_v22 }
 0x311   :  { %2833 = vmatpush3.bf16.msra.mxu0 %v3339_v8 }
 0x312   :  { %2319 = vmatpush3.bf16.msra.mxu1 %v3387_v24  ;;  %2328 = vmatprep.subr.bf16.mxu0 %v3431_v35 }
 0x313   :  { %2320 = vmatprep.subr.bf16.mxu1 %v3390_v25 }
 0x316   :  { %2321 = vmatpush3.bf16.msra.mxu1 %v3393_v26 }
 0x317   :  { %2350 = vmatprep.subr.bf16.mxu1 %v3520_v30 }
 0x38f   :  { %v711_v2 = vpop.f32.mrf.mxu0 }
 0x390   :  { %v717_v3 = vadd.f32 %v711_v2, %v675_v1 }
 0x391   :  { %v2816_v48 = vpop.f32.mrf.mxu0 }
 0x392   :  { %3007 = vtanh.f32 %v717_v3  ;;  %v3649_v48 = vld [vmem:[%s4138_s3 + $0x2] ss:$0 sm:$0xff] }
 0x393   :  { %v714_v38 = vpop.f32.mrf.mxu0 }
 0x395   :  { %v2817_v39 = vpop.f32.mrf.mxu0 }
 0x399   :  { %v2247_v33 = vpop.f32.mrf.mxu1 }
 0x39b   :  { %v2248_v23 = vpop.f32.mrf.mxu1 }
 0x39c   :  { %v2249_v0 = vadd.f32 %v2248_v23, %v2247_v33 }
 0x39d   :  { %v2250_v8 = vpop.f32.mrf.mxu1 }
 0x39e   :  { %v755_v24 = vadd.f32 %v2249_v0, %v3437_v41 }
 0x39f   :  { %v3008_v35 = vpop.eup %3007  ;;  %v2251_v22 = vpop.f32.mrf.mxu1 }
 0x3a0   :  { %v984_v25 = vpack.c.bf16 %v3008_v35, %v3008_v35  ;;  %3009 = vtanh.f32 %v755_v24 }
 0x3a2   :  { %2835 = vmatmul.mubr.bf16.vlgmr.msra.gmra.mxu0 %v984_v25 }
 0x3a3   :  { %2329 = vmatpush3.bf16.msra.mxu0 %v3440_v50 }
 0x3a4   :  { %2330 = vmatprep.subr.bf16.mxu0 %v3442_v52 }
 0x3a7   :  { %2331 = vmatpush3.bf16.msra.mxu0 %v3445_v54 }
 0x3a8   :  { %2332 = vmatprep.subr.bf16.mxu0 %v3449_v56 }
 0x3ab   :  { %2333 = vmatpush3.bf16.msra.mxu0 %v3452_v57 }
 0x3ac   :  { %2334 = vmatprep.subr.bf16.mxu0 %v3455_v58 }
 0x3ad   :  { %v3010_v8 = vpop.eup %3009 }
 0x3ae   :  { %v1027_v1 = vpack.c.bf16 %v3010_v8, %v3010_v8 }
 0x3af   :  { %2335 = vmatpush3.bf16.msra.mxu0 %v3462_v59 }
 0x3b0   :  { %1060 = vmatprep.mubr.bf16.mxu1 %v1027_v1  ;;  %2336 = vmatprep.subr.bf16.mxu0 %v3465_v60 }
 0x3b1   :  { %1061 = vmatmul.mubr.bf16.vlgmr.msra.gmra.mxu1 %v984_v25 }
 0x3b2   :  { %2351 = vmatpush3.bf16.msra.mxu1 %v3528_v49 }
 0x3b3   :  { %2352 = vmatprep.subr.bf16.mxu1 %v3530_v51  ;;  %2337 = vmatpush3.bf16.msra.mxu0 %v3470_v61 }
 0x3b4   :  { %v2269_v0 = vpop.f32.mrf.mxu0  ;;  %2338 = vmatprep.subr.bf16.mxu0 %v3473_v62 }
 0x3b6   :  { %v2270_v22 = vpop.f32.mrf.mxu0  ;;  %2353 = vmatpush3.bf16.msra.mxu1 %v3535_v53 }
 0x3b7   :  { %v2271_v24 = vadd.f32 %v2270_v22, %v2269_v0  ;;  %2354 = vmatprep.subr.bf16.mxu1 %v3539_v55  ;;  %2339 = vmatpush3.bf16.msra.mxu0 %v3478_v63  ;;  %v4159_v0 = vmov 0.0  }
 0x3b8   :  { %v2272_v35 = vpop.f32.mrf.mxu0  ;;  %2340 = vmatprep.subr.bf16.mxu0 %v3481_v13 }
 0x3b9   :  { %v797_v25 = vadd.f32 %v2271_v24, %v3546_v32  ;;  %v2291_v2 = vpop.f32.mrf.mxu1 }
 0x3ba   :  { %v2273_v3 = vpop.f32.mrf.mxu0  ;;  %2355 = vmatpush3.bf16.msra.mxu1 %v3549_v34 }
 0x3bb   :  { %3011 = vtanh.f32 %v797_v25  ;;  %v2292_v38 = vpop.f32.mrf.mxu1  ;;  %2356 = vmatprep.subr.bf16.mxu1 %v3552_v36  ;;  %2341 = vmatpush3.bf16.msra.mxu0 %v3486_v27  ;;  %v3667_v25 = vld [vmem:[#allocation5 + $0x38] sm:$0xff]   ;;  %v3683_v3 = vld [vmem:[#allocation5 + $0x28] sm:$0xff]  }
 0x3bc   :  { %v2293_v39 = vadd.f32 %v2292_v38, %v2291_v2  ;;  %2342 = vmatprep.subr.bf16.mxu0 %v3489_v28 }
 0x3bd   :  { %v2294_v33 = vpop.f32.mrf.mxu1 }
 0x3be   :  { %v975_v23 = vadd.f32 %v2293_v39, %v3649_v48  ;;  %2357 = vmatpush3.bf16.msra.mxu1 %v3558_v40 }
 0x3bf   :  { %v2295_v8 = vpop.f32.mrf.mxu1  ;;  %2358 = vmatprep.subr.bf16.mxu1 %v3561_v42  ;;  %2343 = vmatpush3.bf16.msra.mxu0 %v3494_v29 }
 0x3c0   :  { %3013 = vtanh.f32 %v975_v23  ;;  %2838 = vmatprep.subr.bf16.mxu0 %v4159_v0 }
 0x3c2   :  { %2359 = vmatpush3.bf16.msra.mxu1 %v3566_v43 }
 0x3c3   :  { %2360 = vmatprep.subr.bf16.mxu1 %v3569_v44 }
 0x3c6   :  { %2361 = vmatpush3.bf16.msra.mxu1 %v3574_v45 }
 0x3c7   :  { %2362 = vmatprep.subr.bf16.mxu1 %v3577_v46 }
 0x3c8   :  { %v3012_v22 = vpop.eup %3011 }
 0x3c9   :  { %v1069_v24 = vpack.c.bf16 %v3012_v22, %v3012_v22 }
 0x3ca   :  { %2363 = vmatpush3.bf16.msra.mxu1 %v3582_v47 }
 0x3cb   :  { %1102 = vmatprep.mubr.bf16.mxu0 %v1069_v24  ;;  %2364 = vmatprep.subr.bf16.mxu1 %v3585_v31 }
 0x3cc   :  { %1103 = vmatmul.mubr.bf16.vlgmr.msra.gmra.mxu0 %v1027_v1  ;;  %v3677_v1 = vld [vmem:[#allocation5 + $0x30] sm:$0xff]  }
 0x3cd   :  { %v3665_v35 = vpop.eup %3013  ;;  %2839 = vmatpush3.bf16.msra.mxu0 %v3667_v25  ;;  %2854 = vmatprep.mubr.msk.bf16.mxu0 %vm3235_vm0, %v4159_v0 }
 0x3ce   :  { %4160 = vst [vmem:[#allocation20_spill] sm:$0xff] %v3665_v35  ;;  %2365 = vmatpush3.bf16.msra.mxu1 %v3588_v37  ;;  %v1111_v2 = vpack.c.bf16 %v3665_v35, %v3665_v35  ;;  %2840 = vmatprep.subr.bf16.mxu0 %v4159_v0 }
 0x3cf   :  { %2381 = vmatprep.subr.bf16.mxu1 %v3341_v9  ;;  %v4163_v9 = vld [vmem:[#allocation17_spill] sm:$0xff] }
 0x3d0   :  { %1144 = vmatprep.mubr.bf16.mxu1 %v1111_v2 }
 0x3d1   :  { %1145 = vmatmul.mubr.bf16.vlgmr.msra.gmra.mxu1 %v1069_v24  ;;  %2841 = vmatpush3.bf16.msra.mxu0 %v3677_v1 }
 0x3d2   :  { %2842 = vmatprep.subr.bf16.mxu0 %v4159_v0  ;;  %2382 = vmatpush3.bf16.msra.mxu1 %v3347_v10  ;;  %v4164_v10 = vld [vmem:[#allocation19_spill] sm:$0xff] }
 0x3d3   :  { %2383 = vmatprep.subr.bf16.mxu1 %v3349_v11  ;;  %v983_v11 = vld [vmem:[#allocation2 + $0x20] sm:$0xff] }
 0x3d5   :  { %2843 = vmatpush3.bf16.msra.mxu0 %v3683_v3 }
 0x3d6   :  { %2844 = vmatprep.subr.bf16.mxu0 %v4159_v0  ;;  %2384 = vmatpush3.bf16.msra.mxu1 %v3355_v12 }
 0x3d7   :  { %2385 = vmatprep.subr.bf16.mxu1 %v3357_v14 }
 0x3d9   :  { %2845 = vmatpush3.bf16.msra.mxu0 %v3316_v4  ;;  %v4161_v4 = vld [vmem:[#allocation16_spill] sm:$0xff] }
 0x3da   :  { %2846 = vmatprep.subr.bf16.mxu0 %v4159_v0  ;;  %2386 = vmatpush3.bf16.msra.mxu1 %v3361_v15 }
 0x3db   :  { %2387 = vmatprep.subr.bf16.mxu1 %v3363_v16 }
 0x3dd   :  { %2847 = vmatpush3.bf16.msra.mxu0 %v3322_v5  ;;  %v4162_v5 = vld [vmem:[#allocation15_spill] sm:$0xff] }
 0x3de   :  { %2848 = vmatprep.subr.bf16.mxu0 %v4159_v0  ;;  %2388 = vmatpush3.bf16.msra.mxu1 %v3369_v17 }
 0x3df   :  { %2389 = vmatprep.subr.bf16.mxu1 %v3372_v18 }
 0x3e1   :  { %2849 = vmatpush3.bf16.msra.mxu0 %v3327_v6  ;;  %v4165_v6 = vld [vmem:[#allocation18_spill] sm:$0xff] }
 0x3e2   :  { %2850 = vmatprep.subr.bf16.mxu0 %v4159_v0  ;;  %2390 = vmatpush3.bf16.msra.mxu1 %v3374_v19 }
 0x3e3   :  { %2391 = vmatprep.subr.bf16.mxu1 %v3378_v20 }
 0x3e5   :  { %2851 = vmatpush3.bf16.msra.mxu0 %v3333_v7 }
 0x3e6   :  { %2852 = vmatprep.subr.bf16.mxu0 %v4159_v0  ;;  %2392 = vmatpush3.bf16.msra.mxu1 %v3380_v21 }
 0x3e7   :  { %2393 = vmatprep.subr.bf16.mxu1 %v4161_v4 }
 0x3e9   :  { %2853 = vmatpush3.bf16.msra.mxu0 %v4162_v5 }
 0x3ea   :  { %2394 = vmatpush3.bf16.msra.mxu1 %v4163_v9  ;;  %2403 = vmatprep.subr.bf16.mxu0 %v4164_v10 }
 0x3eb   :  { %2395 = vmatprep.subr.bf16.mxu1 %v4165_v6 }
 0x3ee   :  { %2396 = vmatpush3.bf16.msra.mxu1 %v3393_v26 }
 0x3ef   :  { %2425 = vmatprep.subr.bf16.mxu1 %v3520_v30 }
 0x462   :  { %v1019_v7 = vpop.f32.mrf.mxu0 }
 0x463   :  { %v1025_v12 = vadd.f32 %v1019_v7, %v983_v11 }
 0x464   :  { %v2836_v14 = vpop.f32.mrf.mxu0 }
 0x465   :  { %3015 = vtanh.f32 %v1025_v12 }
 0x466   :  { %v1022_v38 = vpop.f32.mrf.mxu0 }
 0x468   :  { %v2837_v39 = vpop.f32.mrf.mxu0 }
 0x471   :  { %v2322_v33 = vpop.f32.mrf.mxu1 }
 0x472   :  { %v3016_v23 = vpop.eup %3015 }
 0x473   :  { %v1156_v8 = vpack.c.bf16 %v3016_v23, %v3016_v23  ;;  %v2323_v22 = vpop.f32.mrf.mxu1 }
 0x474   :  { %v2324_v24 = vadd.f32 %v2323_v22, %v2322_v33 }
 0x475   :  { %v2325_v2 = vpop.f32.mrf.mxu1  ;;  %2855 = vmatmul.mubr.bf16.vlgmr.msra.gmra.mxu0 %v1156_v8 }
 0x476   :  { %v1063_v5 = vadd.f32 %v2324_v24, %v3437_v41  ;;  %2404 = vmatpush3.bf16.msra.mxu0 %v3440_v50 }
 0x477   :  { %v2326_v35 = vpop.f32.mrf.mxu1  ;;  %2405 = vmatprep.subr.bf16.mxu0 %v3442_v52 }
 0x478   :  { %3017 = vtanh.f32 %v1063_v5 }
 0x47a   :  { %2406 = vmatpush3.bf16.msra.mxu0 %v3445_v54 }
 0x47b   :  { %2407 = vmatprep.subr.bf16.mxu0 %v3449_v56 }
 0x47e   :  { %2408 = vmatpush3.bf16.msra.mxu0 %v3452_v57 }
 0x47f   :  { %2409 = vmatprep.subr.bf16.mxu0 %v3455_v58 }
 0x482   :  { %2410 = vmatpush3.bf16.msra.mxu0 %v3462_v59 }
 0x483   :  { %2411 = vmatprep.subr.bf16.mxu0 %v3465_v60 }
 0x485   :  { %v3018_v11 = vpop.eup %3017 }
 0x486   :  { %v1199_v7 = vpack.c.bf16 %v3018_v11, %v3018_v11  ;;  %2412 = vmatpush3.bf16.msra.mxu0 %v3470_v61 }
 0x487   :  { %2413 = vmatprep.subr.bf16.mxu0 %v3473_v62 }
 0x488   :  { %1232 = vmatprep.mubr.bf16.mxu1 %v1199_v7 }
 0x489   :  { %1233 = vmatmul.mubr.bf16.vlgmr.msra.gmra.mxu1 %v1156_v8 }
 0x48a   :  { %2426 = vmatpush3.bf16.msra.mxu1 %v3528_v49  ;;  %2414 = vmatpush3.bf16.msra.mxu0 %v3478_v63 }
 0x48b   :  { %2427 = vmatprep.subr.bf16.mxu1 %v3530_v51  ;;  %2415 = vmatprep.subr.bf16.mxu0 %v3481_v13 }
 0x48c   :  { %v2344_v35 = vpop.f32.mrf.mxu0 }
 0x48e   :  { %v2345_v12 = vpop.f32.mrf.mxu0  ;;  %2428 = vmatpush3.bf16.msra.mxu1 %v3535_v53  ;;  %2416 = vmatpush3.bf16.msra.mxu0 %v3486_v27 }
 0x48f   :  { %v2346_v14 = vadd.f32 %v2345_v12, %v2344_v35  ;;  %2429 = vmatprep.subr.bf16.mxu1 %v3539_v55  ;;  %2417 = vmatprep.subr.bf16.mxu0 %v3489_v28 }
 0x490   :  { %v2347_v38 = vpop.f32.mrf.mxu0 }
 0x491   :  { %v1105_v39 = vadd.f32 %v2346_v14, %v3546_v32  ;;  %v2366_v33 = vpop.f32.mrf.mxu1  ;;  %v3753_v38 = vld [vmem:[#allocation7 + $0x78] sm:$0xff]  }
 0x492   :  { %v2348_v23 = vpop.f32.mrf.mxu0  ;;  %2430 = vmatpush3.bf16.msra.mxu1 %v3549_v34  ;;  %2418 = vmatpush3.bf16.msra.mxu0 %v3494_v29 }
 0x493   :  { %3019 = vtanh.f32 %v1105_v39  ;;  %v2367_v8 = vpop.f32.mrf.mxu1  ;;  %2431 = vmatprep.subr.bf16.mxu1 %v3552_v36  ;;  %2858 = vmatprep.subr.bf16.mxu0 %v4159_v0  ;;  %v3761_v39 = vld [vmem:[#allocation7 + $0x70] sm:$0xff]   ;;  %v3769_v23 = vld [vmem:[#allocation7 + $0x68] sm:$0xff]  }
 0x494   :  { %v2368_v22 = vadd.f32 %v2367_v8, %v2366_v33  ;;  %v3766_v33 = vld [vmem:[#allocation7 + $0x30] sm:$0xff]   ;;  %v3772_v8 = vld [vmem:[#allocation5 + $0x20] sm:$0xff]  }
 0x495   :  { %v2369_v24 = vpop.f32.mrf.mxu1 }
 0x496   :  { %v1147_v2 = vadd.f32 %v2368_v22, %v3649_v48  ;;  %2432 = vmatpush3.bf16.msra.mxu1 %v3558_v40  ;;  %v3778_v22 = vld [vmem:[#allocation5 + $0x18] sm:$0xff]   ;;  %v3784_v24 = vld [vmem:[#allocation5 + $0x10] sm:$0xff]  }
 0x497   :  { %v2370_v5 = vpop.f32.mrf.mxu1  ;;  %2433 = vmatprep.subr.bf16.mxu1 %v3561_v42 }
 0x498   :  { %3021 = vtanh.f32 %v1147_v2 }
 0x49a   :  { %2434 = vmatpush3.bf16.msra.mxu1 %v3566_v43 }
 0x49b   :  { %2435 = vmatprep.subr.bf16.mxu1 %v3569_v44 }
 0x49e   :  { %2436 = vmatpush3.bf16.msra.mxu1 %v3574_v45 }
 0x49f   :  { %2437 = vmatprep.subr.bf16.mxu1 %v3577_v46 }
 0x4a0   :  { %v3020_v11 = vpop.eup %3019 }
 0x4a1   :  { %v1241_v35 = vpack.c.bf16 %v3020_v11, %v3020_v11 }
 0x4a2   :  { %2438 = vmatpush3.bf16.msra.mxu1 %v3582_v47 }
 0x4a3   :  { %1274 = vmatprep.mubr.bf16.mxu0 %v1241_v35  ;;  %2439 = vmatprep.subr.bf16.mxu1 %v3585_v31 }
 0x4a4   :  { %1275 = vmatmul.mubr.bf16.vlgmr.msra.gmra.mxu0 %v1199_v7  ;;  %v3758_v7 = vld [vmem:[#allocation7 + $0x38] sm:$0xff]  }
 0x4a5   :  { %v3744_v12 = vpop.eup %3021  ;;  %2859 = vmatpush3.bf16.msra.mxu0 %v3667_v25  ;;  %2874 = vmatprep.mubr.msk.bf16.mxu0 %vm3235_vm0, %v4159_v0 }
 0x4a6   :  { %2440 = vmatpush3.bf16.msra.mxu1 %v3588_v37  ;;  %v1283_v14 = vpack.c.bf16 %v3744_v12, %v3744_v12  ;;  %2860 = vmatprep.subr.bf16.mxu0 %v4159_v0 }
 0x4a7   :  { %2456 = vmatprep.subr.bf16.mxu1 %v3753_v38 }
 0x4a8   :  { %1316 = vmatprep.mubr.bf16.mxu1 %v1283_v14 }
 0x4a9   :  { %1317 = vmatmul.mubr.bf16.vlgmr.msra.gmra.mxu1 %v1241_v35  ;;  %2861 = vmatpush3.bf16.msra.mxu0 %v3677_v1 }
 0x4aa   :  { %2862 = vmatprep.subr.bf16.mxu0 %v4159_v0  ;;  %2457 = vmatpush3.bf16.msra.mxu1 %v3758_v7 }
 0x4ab   :  { %2458 = vmatprep.subr.bf16.mxu1 %v3761_v39 }
 0x4ad   :  { %2863 = vmatpush3.bf16.msra.mxu0 %v3683_v3 }
 0x4ae   :  { %2864 = vmatprep.subr.bf16.mxu0 %v4159_v0  ;;  %2459 = vmatpush3.bf16.msra.mxu1 %v3766_v33 }
 0x4af   :  { %2460 = vmatprep.subr.bf16.mxu1 %v3769_v23 }
 0x4b1   :  { %2865 = vmatpush3.bf16.msra.mxu0 %v3772_v8 }
 0x4b2   :  { %2866 = vmatprep.subr.bf16.mxu0 %v4159_v0  ;;  %2461 = vmatpush3.bf16.msra.mxu1 %v3361_v15  ;;  %v3790_v15 = vld [vmem:[#allocation5 + $0x8] sm:$0xff]  }
 0x4b3   :  { %2462 = vmatprep.subr.bf16.mxu1 %v3363_v16  ;;  %v3796_v16 = vld [vmem:[#allocation5] sm:$0xff]  }
 0x4b5   :  { %2867 = vmatpush3.bf16.msra.mxu0 %v3778_v22 }
 0x4b6   :  { %2868 = vmatprep.subr.bf16.mxu0 %v4159_v0  ;;  %2463 = vmatpush3.bf16.msra.mxu1 %v3369_v17  ;;  %v1155_v17 = vld [vmem:[#allocation2 + $0x28] sm:$0xff] }
 0x4b7   :  { %2464 = vmatprep.subr.bf16.mxu1 %v3372_v18 }
 0x4b9   :  { %2869 = vmatpush3.bf16.msra.mxu0 %v3784_v24 }
 0x4ba   :  { %2870 = vmatprep.subr.bf16.mxu0 %v4159_v0  ;;  %2465 = vmatpush3.bf16.msra.mxu1 %v3374_v19 }
 0x4bb   :  { %2466 = vmatprep.subr.bf16.mxu1 %v3378_v20 }
 0x4bd   :  { %2871 = vmatpush3.bf16.msra.mxu0 %v3790_v15 }
 0x4be   :  { %2872 = vmatprep.subr.bf16.mxu0 %v4159_v0  ;;  %2467 = vmatpush3.bf16.msra.mxu1 %v3380_v21 }
 0x4bf   :  { %2468 = vmatprep.subr.bf16.mxu1 %v4161_v4 }
 0x4c1   :  { %2873 = vmatpush3.bf16.msra.mxu0 %v3796_v16 }
 0x4c2   :  { %2469 = vmatpush3.bf16.msra.mxu1 %v4163_v9  ;;  %2478 = vmatprep.subr.bf16.mxu0 %v4164_v10 }
 0x4c3   :  { %2470 = vmatprep.subr.bf16.mxu1 %v4165_v6 }
 0x4c6   :  { %2471 = vmatpush3.bf16.msra.mxu1 %v3393_v26 }
 0x4c7   :  { %2500 = vmatprep.subr.bf16.mxu1 %v3520_v30 }
 0x535   :  { %v1191_v18 = vpop.f32.mrf.mxu0 }
 0x536   :  { %v1197_v19 = vadd.f32 %v1191_v18, %v1155_v17 }
 0x537   :  { %v2856_v20 = vpop.f32.mrf.mxu0 }
 0x538   :  { %3023 = vtanh.f32 %v1197_v19 }
 0x539   :  { %v1194_v21 = vpop.f32.mrf.mxu0 }
 0x53a   :  { %v4166_v21 = vld [vmem:[#allocation20_spill] sm:$0xff] }
 0x53b   :  { %v2857_v4 = vpop.f32.mrf.mxu0 }
 0x53c   :  { %v1153_v4 = vadd.f32 %v3744_v12, %v4166_v21  ;;  %v3868_v12 = vld [vmem:[#allocation7 + $0x58] sm:$0xff]  }
 0x545   :  { %v3024_v2 = vpop.eup %3023 }
 0x546   :  { %v1328_v5 = vpack.c.bf16 %v3024_v2, %v3024_v2 }
 0x548   :  { %2875 = vmatmul.mubr.bf16.vlgmr.msra.gmra.mxu0 %v1328_v5 }
 0x549   :  { %v2397_v11 = vpop.f32.mrf.mxu1  ;;  %2479 = vmatpush3.bf16.msra.mxu0 %v3440_v50 }
 0x54a   :  { %2480 = vmatprep.subr.bf16.mxu0 %v3442_v52 }
 0x54b   :  { %v2398_v9 = vpop.f32.mrf.mxu1 }
 0x54c   :  { %v2399_v10 = vadd.f32 %v2398_v9, %v2397_v11  ;;  %v3876_v9 = vld [vmem:[#allocation7 + $0x50] sm:$0xff]  }
 0x54d   :  { %v2400_v26 = vpop.f32.mrf.mxu1  ;;  %2481 = vmatpush3.bf16.msra.mxu0 %v3445_v54 }
 0x54e   :  { %v1235_v6 = vadd.f32 %v2399_v10, %v3437_v41  ;;  %2482 = vmatprep.subr.bf16.mxu0 %v3449_v56  ;;  %v3884_v10 = vld [vmem:[#allocation7 + $0x48] sm:$0xff]   ;;  %v3891_v26 = vld [vmem:[#allocation7 + $0xf8] sm:$0xff]  }
 0x54f   :  { %v2401_v35 = vpop.f32.mrf.mxu1 }
 0x550   :  { %3025 = vtanh.f32 %v1235_v6  ;;  %v3897_v6 = vld [vmem:[#allocation7] sm:$0xff]   ;;  %v1327_v35 = vld [vmem:[#allocation2 + $0x30] sm:$0xff] }
 0x551   :  { %2483 = vmatpush3.bf16.msra.mxu0 %v3452_v57 }
 0x552   :  { %2484 = vmatprep.subr.bf16.mxu0 %v3455_v58 }
 0x555   :  { %2485 = vmatpush3.bf16.msra.mxu0 %v3462_v59 }
 0x556   :  { %2486 = vmatprep.subr.bf16.mxu0 %v3465_v60 }
 0x559   :  { %2487 = vmatpush3.bf16.msra.mxu0 %v3470_v61 }
 0x55a   :  { %2488 = vmatprep.subr.bf16.mxu0 %v3473_v62 }
 0x55d   :  { %v3026_v50 = vpop.eup %3025  ;;  %2489 = vmatpush3.bf16.msra.mxu0 %v3478_v63 }
 0x55e   :  { %v1371_v41 = vpack.c.bf16 %v3026_v50, %v3026_v50  ;;  %2490 = vmatprep.subr.bf16.mxu0 %v3481_v13 }
 0x560   :  { %1404 = vmatprep.mubr.bf16.mxu1 %v1371_v41 }
 0x561   :  { %1405 = vmatmul.mubr.bf16.vlgmr.msra.gmra.mxu1 %v1328_v5  ;;  %2491 = vmatpush3.bf16.msra.mxu0 %v3486_v27 }
 0x562   :  { %2501 = vmatpush3.bf16.msra.mxu1 %v3528_v49  ;;  %2492 = vmatprep.subr.bf16.mxu0 %v3489_v28 }
 0x563   :  { %2502 = vmatprep.subr.bf16.mxu1 %v3530_v51 }
 0x564   :  { %v2419_v52 = vpop.f32.mrf.mxu0 }
 0x565   :  { %2493 = vmatpush3.bf16.msra.mxu0 %v3494_v29 }
 0x566   :  { %v2420_v54 = vpop.f32.mrf.mxu0  ;;  %2503 = vmatpush3.bf16.msra.mxu1 %v3535_v53  ;;  %2878 = vmatprep.subr.bf16.mxu0 %v4159_v0 }
 0x567   :  { %v2421_v56 = vadd.f32 %v2420_v54, %v2419_v52  ;;  %2504 = vmatprep.subr.bf16.mxu1 %v3539_v55 }
 0x568   :  { %v2422_v57 = vpop.f32.mrf.mxu0 }
 0x569   :  { %v1277_v58 = vadd.f32 %v2421_v56, %v3546_v32  ;;  %v2441_v59 = vpop.f32.mrf.mxu1 }
 0x56a   :  { %v2423_v60 = vpop.f32.mrf.mxu0  ;;  %2505 = vmatpush3.bf16.msra.mxu1 %v3549_v34 }
 0x56b   :  { %3027 = vtanh.f32 %v1277_v58  ;;  %v2442_v61 = vpop.f32.mrf.mxu1  ;;  %2506 = vmatprep.subr.bf16.mxu1 %v3552_v36  ;;  %v3901_v58 = vld [vmem:[#allocation7 + $0xb8] sm:$0xff]   ;;  %v3907_v60 = vld [vmem:[#allocation7 + $0xb0] sm:$0xff]  }
 0x56c   :  { %v2443_v62 = vadd.f32 %v2442_v61, %v2441_v59  ;;  %v3904_v59 = vld [vmem:[#allocation7 + $0xf0] sm:$0xff]   ;;  %v3910_v61 = vld [vmem:[#allocation7 + $0xe8] sm:$0xff]  }
 0x56d   :  { %v2444_v14 = vpop.f32.mrf.mxu1 }
 0x56e   :  { %v1319_v17 = vadd.f32 %v2443_v62, %v3649_v48  ;;  %2507 = vmatpush3.bf16.msra.mxu1 %v3558_v40 }
 0x56f   :  { %v2445_v18 = vpop.f32.mrf.mxu1  ;;  %2508 = vmatprep.subr.bf16.mxu1 %v3561_v42 }
 0x570   :  { %3029 = vtanh.f32 %v1319_v17  ;;  %v3913_v17 = vld [vmem:[#allocation7 + $0xa8] sm:$0xff]  }
 0x572   :  { %2509 = vmatpush3.bf16.msra.mxu1 %v3566_v43 }
 0x573   :  { %2510 = vmatprep.subr.bf16.mxu1 %v3569_v44 }
 0x576   :  { %2511 = vmatpush3.bf16.msra.mxu1 %v3574_v45 }
 0x577   :  { %2512 = vmatprep.subr.bf16.mxu1 %v3577_v46 }
 0x578   :  { %v3028_v19 = vpop.eup %3027 }
 0x579   :  { %v1413_v20 = vpack.c.bf16 %v3028_v19, %v3028_v19  ;;  %v3916_v19 = vld [vmem:[#allocation7 + $0xe0] sm:$0xff]  }
 0x57a   :  { %2513 = vmatpush3.bf16.msra.mxu1 %v3582_v47 }
 0x57b   :  { %1446 = vmatprep.mubr.bf16.mxu0 %v1413_v20  ;;  %2514 = vmatprep.subr.bf16.mxu1 %v3585_v31 }
 0x57c   :  { %1447 = vmatmul.mubr.bf16.vlgmr.msra.gmra.mxu0 %v1371_v41 }
 0x57d   :  { %v3030_v2 = vpop.eup %3029  ;;  %2879 = vmatpush3.bf16.msra.mxu0 %v3667_v25  ;;  %2894 = vmatprep.mubr.msk.bf16.mxu0 %vm3235_vm0, %v4159_v0  ;;  %v3857_v25 = vld [vmem:[#allocation7 + $0x28] sm:$0xff]  }
 0x57e   :  { %v3842_v5 = vadd.f32 %v3030_v2, %v1153_v4  ;;  %2515 = vmatpush3.bf16.msra.mxu1 %v3588_v37  ;;  %v1455_v11 = vpack.c.bf16 %v3030_v2, %v3030_v2  ;;  %2880 = vmatprep.subr.bf16.mxu0 %v4159_v0  ;;  %v3925_v2 = vld [vmem:[#allocation7 + $0xa0] sm:$0xff]  }
 0x57f   :  { %2531 = vmatprep.subr.bf16.mxu1 %v3753_v38 }
 0x580   :  { %1488 = vmatprep.mubr.bf16.mxu1 %v1455_v11  ;;  %v3928_v11 = vld [vmem:[#allocation7 + $0xd8] sm:$0xff]  }
 0x581   :  { %1489 = vmatmul.mubr.bf16.vlgmr.msra.gmra.mxu1 %v1413_v20  ;;  %2881 = vmatpush3.bf16.msra.mxu0 %v3677_v1  ;;  %v3860_v1 = vld [vmem:[#allocation7 + $0x60] sm:$0xff]  }
 0x582   :  { %2882 = vmatprep.subr.bf16.mxu0 %v4159_v0  ;;  %2532 = vmatpush3.bf16.msra.mxu1 %v3758_v7  ;;  %v3922_v20 = vld [vmem:[%s4138_s3] ss:$0 sm:$0xff] }
 0x583   :  { %2533 = vmatprep.subr.bf16.mxu1 %v3761_v39 }
 0x585   :  { %2883 = vmatpush3.bf16.msra.mxu0 %v3683_v3  ;;  %v3865_v3 = vld [vmem:[#allocation7 + $0x20] sm:$0xff]  }
 0x586   :  { %2884 = vmatprep.subr.bf16.mxu0 %v4159_v0  ;;  %2534 = vmatpush3.bf16.msra.mxu1 %v3766_v33 }
 0x587   :  { %2535 = vmatprep.subr.bf16.mxu1 %v3769_v23 }
 0x589   :  { %2885 = vmatpush3.bf16.msra.mxu0 %v3772_v8  ;;  %v3873_v8 = vld [vmem:[#allocation7 + $0x18] sm:$0xff]  }
 0x58a   :  { %2886 = vmatprep.subr.bf16.mxu0 %v4159_v0  ;;  %2536 = vmatpush3.bf16.msra.mxu1 %v3857_v25 }
 0x58b   :  { %2537 = vmatprep.subr.bf16.mxu1 %v3860_v1 }
 0x58d   :  { %2887 = vmatpush3.bf16.msra.mxu0 %v3778_v22  ;;  %v3881_v22 = vld [vmem:[#allocation7 + $0x10] sm:$0xff]  }
 0x58e   :  { %2888 = vmatprep.subr.bf16.mxu0 %v4159_v0  ;;  %2538 = vmatpush3.bf16.msra.mxu1 %v3865_v3 }
 0x58f   :  { %2539 = vmatprep.subr.bf16.mxu1 %v3868_v12 }
 0x591   :  { %2889 = vmatpush3.bf16.msra.mxu0 %v3784_v24  ;;  %v3888_v24 = vld [vmem:[#allocation7 + $0x8] sm:$0xff]  }
 0x592   :  { %2890 = vmatprep.subr.bf16.mxu0 %v4159_v0  ;;  %2540 = vmatpush3.bf16.msra.mxu1 %v3873_v8 }
 0x593   :  { %2541 = vmatprep.subr.bf16.mxu1 %v3876_v9 }
 0x595   :  { %2891 = vmatpush3.bf16.msra.mxu0 %v3790_v15  ;;  %v3894_v15 = vld [vmem:[#allocation7 + $0x40] sm:$0xff]  }
 0x596   :  { %2892 = vmatprep.subr.bf16.mxu0 %v4159_v0  ;;  %2542 = vmatpush3.bf16.msra.mxu1 %v3881_v22 }
 0x597   :  { %2543 = vmatprep.subr.bf16.mxu1 %v3884_v10 }
 0x599   :  { %2893 = vmatpush3.bf16.msra.mxu0 %v3796_v16 }
 0x59a   :  { %2544 = vmatpush3.bf16.msra.mxu1 %v3888_v24  ;;  %2553 = vmatprep.subr.bf16.mxu0 %v3891_v26 }
 0x59b   :  { %2545 = vmatprep.subr.bf16.mxu1 %v3894_v15 }
 0x59e   :  { %2546 = vmatpush3.bf16.msra.mxu1 %v3897_v6 }
 0x59f   :  { %2575 = vmatprep.subr.bf16.mxu1 %v3520_v30 }
 0x608   :  { %v1363_v16 = vpop.f32.mrf.mxu0 }
 0x609   :  { %v1369_v50 = vadd.f32 %v1363_v16, %v1327_v35  ;;  %v3931_v35 = vld [vmem:[#allocation7 + $0x98] sm:$0xff]   ;;  %v3934_v16 = vld [vmem:[#allocation7 + $0xd0] sm:$0xff]  }
 0x60a   :  { %v2876_v41 = vpop.f32.mrf.mxu0 }
 0x60b   :  { %3031 = vtanh.f32 %v1369_v50 }
 0x60c   :  { %v1366_v52 = vpop.f32.mrf.mxu0 }
 0x60e   :  { %v2877_v54 = vpop.f32.mrf.mxu0 }
 0x618   :  { %v3032_v56 = vpop.eup %3031 }
 0x619   :  { %v1500_v57 = vpack.c.bf16 %v3032_v56, %v3032_v56 }
 0x61b   :  { %2895 = vmatmul.mubr.bf16.vlgmr.msra.gmra.mxu0 %v1500_v57 }
 0x61c   :  { %2554 = vmatpush3.bf16.msra.mxu0 %v3901_v58 }
 0x61d   :  { %2555 = vmatprep.subr.bf16.mxu0 %v3904_v59 }
 0x620   :  { %2556 = vmatpush3.bf16.msra.mxu0 %v3907_v60 }
 0x621   :  { %v2472_v30 = vpop.f32.mrf.mxu1  ;;  %2557 = vmatprep.subr.bf16.mxu0 %v3910_v61 }
 0x623   :  { %v2473_v62 = vpop.f32.mrf.mxu1 }
 0x624   :  { %v2474_v14 = vadd.f32 %v2473_v62, %v2472_v30  ;;  %2558 = vmatpush3.bf16.msra.mxu0 %v3913_v17  ;;  %v4015_v30 = vld [vmem:[#allocation7 + $0x130] sm:$0xff]  }
 0x625   :  { %v2475_v18 = vpop.f32.mrf.mxu1  ;;  %2559 = vmatprep.subr.bf16.mxu0 %v3916_v19 }
 0x626   :  { %v1407_v21 = vadd.f32 %v3922_v20, %v2474_v14  ;;  %v4018_v14 = vld [vmem:[#allocation7 + $0x168] sm:$0xff]  }
 0x627   :  { %v2476_v4 = vpop.f32.mrf.mxu1 }
 0x628   :  { %3033 = vtanh.f32 %v1407_v21  ;;  %2560 = vmatpush3.bf16.msra.mxu0 %v3925_v2  ;;  %v4024_v21 = vld [vmem:[%s4138_s3 + $0x1] ss:$0 sm:$0xff] }
 0x629   :  { %2561 = vmatprep.subr.bf16.mxu0 %v3928_v11 }
 0x62c   :  { %2562 = vmatpush3.bf16.msra.mxu0 %v3931_v35 }
 0x62d   :  { %2563 = vmatprep.subr.bf16.mxu0 %v3934_v16 }
 0x630   :  { %2564 = vmatpush3.bf16.msra.mxu0 %v3478_v63 }
 0x631   :  { %2565 = vmatprep.subr.bf16.mxu0 %v3481_v13 }
 0x634   :  { %2566 = vmatpush3.bf16.msra.mxu0 %v3486_v27 }
 0x635   :  { %v3034_v50 = vpop.eup %3033  ;;  %2567 = vmatprep.subr.bf16.mxu0 %v3489_v28 }
 0x636   :  { %v1543_v41 = vpack.c.bf16 %v3034_v50, %v3034_v50 }
 0x638   :  { %1576 = vmatprep.mubr.bf16.mxu1 %v1543_v41  ;;  %2568 = vmatpush3.bf16.msra.mxu0 %v3494_v29 }
 0x639   :  { %1577 = vmatmul.mubr.bf16.vlgmr.msra.gmra.mxu1 %v1500_v57  ;;  %2597 = vmatprep.subr.bf16.mxu0 %v3753_v38 }
 0x63a   :  { %2576 = vmatpush3.bf16.msra.mxu1 %v3528_v49 }
 0x63b   :  { %2577 = vmatprep.subr.bf16.mxu1 %v3530_v51 }
 0x63c   :  { %v2494_v52 = vpop.f32.mrf.mxu0 }
 0x63e   :  { %v2495_v63 = vpop.f32.mrf.mxu0  ;;  %2578 = vmatpush3.bf16.msra.mxu1 %v3535_v53 }
 0x63f   :  { %v2496_v13 = vadd.f32 %v2495_v63, %v2494_v52  ;;  %2579 = vmatprep.subr.bf16.mxu1 %v3539_v55  ;;  %v4027_v52 = vld [vmem:[#allocation7 + $0x128] sm:$0xff]  }
 0x640   :  { %v2497_v27 = vpop.f32.mrf.mxu0 }
 0x641   :  { %v1449_v28 = vadd.f32 %v2496_v13, %v3546_v32  ;;  %v2516_v54 = vpop.f32.mrf.mxu1  ;;  %v4030_v13 = vld [vmem:[#allocation7 + $0x160] sm:$0xff]  }
 0x642   :  { %v2498_v56 = vpop.f32.mrf.mxu0  ;;  %2580 = vmatpush3.bf16.msra.mxu1 %v3549_v34 }
 0x643   :  { %3035 = vtanh.f32 %v1449_v28  ;;  %v2517_v29 = vpop.f32.mrf.mxu1  ;;  %2581 = vmatprep.subr.bf16.mxu1 %v3552_v36  ;;  %v4034_v56 = vld [vmem:[#allocation7 + $0x120] sm:$0xff]  }
 0x644   :  { %v2518_v49 = vadd.f32 %v2517_v29, %v2516_v54 }
 0x645   :  { %v2519_v51 = vpop.f32.mrf.mxu1 }
 0x646   :  { %v1491_v38 = vadd.f32 %v2518_v49, %v3649_v48  ;;  %2582 = vmatpush3.bf16.msra.mxu1 %v3558_v40  ;;  %v4037_v49 = vld [vmem:[#allocation7 + $0x158] sm:$0xff]  }
 0x647   :  { %v2520_v53 = vpop.f32.mrf.mxu1  ;;  %2583 = vmatprep.subr.bf16.mxu1 %v3561_v42  ;;  %v3988_v42 = vld [vmem:[#allocation7 + $0x90] sm:$0xff]   ;;  %v4040_v51 = vld [vmem:[#allocation7 + $0x118] sm:$0xff]  }
 0x648   :  { %3037 = vtanh.f32 %v1491_v38  ;;  %v4043_v38 = vld [vmem:[#allocation7 + $0x150] sm:$0xff]  }
 0x649   :  { %v4046_v53 = vld [vmem:[#allocation7 + $0x110] sm:$0xff]  }
 0x64a   :  { %2584 = vmatpush3.bf16.msra.mxu1 %v3566_v43  ;;  %v3991_v43 = vld [vmem:[#allocation7 + $0xc8] sm:$0xff]  }
 0x64b   :  { %2585 = vmatprep.subr.bf16.mxu1 %v3569_v44  ;;  %v3995_v44 = vld [vmem:[#allocation7 + $0x178] sm:$0xff]  }
 0x64e   :  { %2586 = vmatpush3.bf16.msra.mxu1 %v3574_v45  ;;  %v3998_v45 = vld [vmem:[#allocation7 + $0x88] sm:$0xff]  }
 0x64f   :  { %2587 = vmatprep.subr.bf16.mxu1 %v3577_v46  ;;  %v4001_v46 = vld [vmem:[#allocation7 + $0xc0] sm:$0xff]  }
 0x650   :  { %v3036_v55 = vpop.eup %3035 }
 0x651   :  { %v1585_v32 = vpack.c.bf16 %v3036_v55, %v3036_v55  ;;  %v4049_v55 = vld [vmem:[#allocation7 + $0x148] sm:$0xff]  }
 0x652   :  { %2588 = vmatpush3.bf16.msra.mxu1 %v3582_v47  ;;  %v4004_v47 = vld [vmem:[#allocation7 + $0x80] sm:$0xff]  }
 0x653   :  { %1618 = vmatprep.mubr.bf16.mxu0 %v1585_v32  ;;  %2589 = vmatprep.subr.bf16.mxu1 %v3585_v31 }
 0x654   :  { %1619 = vmatmul.mubr.bf16.vlgmr.msra.gmra.mxu0 %v1543_v41 }
 0x655   :  { %v3038_v34 = vpop.eup %3037  ;;  %2598 = vmatpush3.bf16.msra.mxu0 %v3758_v7 }
 0x656   :  { %2590 = vmatpush3.bf16.msra.mxu1 %v3588_v37  ;;  %v1627_v36 = vpack.c.bf16 %v3038_v34, %v3038_v34  ;;  %2599 = vmatprep.subr.bf16.mxu0 %v3761_v39  ;;  %v3963_v40 = vadd.f32 %v3038_v34, %v3842_v5 }
 0x657   :  { %2619 = vmatprep.subr.bf16.mxu1 %v3891_v26 }
 0x658   :  { %1660 = vmatprep.mubr.bf16.mxu1 %v1627_v36  ;;  %v4052_v36 = vld [vmem:[#allocation7 + $0x108] sm:$0xff]  }
 0x659   :  { %1661 = vmatmul.mubr.bf16.vlgmr.msra.gmra.mxu1 %v1585_v32  ;;  %2600 = vmatpush3.bf16.msra.mxu0 %v3766_v33  ;;  %v1499_v33 = vld [vmem:[#allocation2 + $0x38] sm:$0xff] }
 0x65a   :  { %2601 = vmatprep.subr.bf16.mxu0 %v3769_v23  ;;  %2620 = vmatpush3.bf16.msra.mxu1 %v3901_v58 }
 0x65b   :  { %2621 = vmatprep.subr.bf16.mxu1 %v3904_v59 }
 0x65d   :  { %2602 = vmatpush3.bf16.msra.mxu0 %v3857_v25 }
 0x65e   :  { %2603 = vmatprep.subr.bf16.mxu0 %v3860_v1  ;;  %2622 = vmatpush3.bf16.msra.mxu1 %v3907_v60 }
 0x65f   :  { %2623 = vmatprep.subr.bf16.mxu1 %v3910_v61 }
 0x661   :  { %2604 = vmatpush3.bf16.msra.mxu0 %v3865_v3 }
 0x662   :  { %2605 = vmatprep.subr.bf16.mxu0 %v3868_v12  ;;  %2624 = vmatpush3.bf16.msra.mxu1 %v3913_v17 }
 0x663   :  { %2625 = vmatprep.subr.bf16.mxu1 %v3916_v19 }
 0x665   :  { %2606 = vmatpush3.bf16.msra.mxu0 %v3873_v8 }
 0x666   :  { %2607 = vmatprep.subr.bf16.mxu0 %v3876_v9  ;;  %2626 = vmatpush3.bf16.msra.mxu1 %v3925_v2 }
 0x667   :  { %2627 = vmatprep.subr.bf16.mxu1 %v3928_v11 }
 0x669   :  { %2608 = vmatpush3.bf16.msra.mxu0 %v3881_v22 }
 0x66a   :  { %2609 = vmatprep.subr.bf16.mxu0 %v3884_v10  ;;  %2628 = vmatpush3.bf16.msra.mxu1 %v3931_v35 }
 0x66b   :  { %2629 = vmatprep.subr.bf16.mxu1 %v3934_v16 }
 0x66d   :  { %2610 = vmatpush3.bf16.msra.mxu0 %v3888_v24 }
 0x66e   :  { %2611 = vmatprep.subr.bf16.mxu0 %v3894_v15  ;;  %2630 = vmatpush3.bf16.msra.mxu1 %v3988_v42  ;;  %v4012_v15 = vld [vmem:[#allocation7 + $0x170] sm:$0xff]  }
 0x66f   :  { %2631 = vmatprep.subr.bf16.mxu1 %v3991_v43 }
 0x671   :  { %2612 = vmatpush3.bf16.msra.mxu0 %v3897_v6 }
 0x672   :  { %2641 = vmatprep.subr.bf16.mxu0 %v3995_v44  ;;  %2632 = vmatpush3.bf16.msra.mxu1 %v3998_v45 }
 0x673   :  { %2633 = vmatprep.subr.bf16.mxu1 %v4001_v46 }
 0x676   :  { %2634 = vmatpush3.bf16.msra.mxu1 %v4004_v47 }
 0x677   :  { %2663 = vmatprep.subr.bf16.mxu1 %v3891_v26  ;;  %v4009_v26 = vld [vmem:[#allocation7 + $0x138] sm:$0xff]  }
 0x6db   :  { %v1535_v31 = vpop.f32.mrf.mxu0 }
 0x6dc   :  { %v1541_v5 = vadd.f32 %v1535_v31, %v1499_v33  ;;  %v4055_v31 = vld [vmem:[#allocation7 + $0x140] sm:$0xff]  }
 0x6dd   :  { %v2896_v37 = vpop.f32.mrf.mxu0 }
 0x6de   :  { %3039 = vtanh.f32 %v1541_v5 }
 0x6df   :  { %v1538_v7 = vpop.f32.mrf.mxu0 }
 0x6e0   :  { %v4059_v7 = vld [vmem:[#allocation7 + $0x100] sm:$0xff]  }
 0x6e1   :  { %v2897_v39 = vpop.f32.mrf.mxu0 }
 0x6eb   :  { %v3040_v9 = vpop.eup %3039 }
 0x6ec   :  { %v1670_v24 = vpack.c.bf16 %v3040_v9, %v3040_v9 }
 0x6f9   :  { %v2547_v23 = vpop.f32.mrf.mxu1 }
 0x6fb   :  { %v2548_v25 = vpop.f32.mrf.mxu1 }
 0x6fc   :  { %v2549_v1 = vadd.f32 %v2548_v25, %v2547_v23 }
 0x6fd   :  { %v2550_v3 = vpop.f32.mrf.mxu1 }
 0x6fe   :  { %v1579_v12 = vadd.f32 %v3922_v20, %v2549_v1 }
 0x6ff   :  { %v2551_v8 = vpop.f32.mrf.mxu1 }
 0x700   :  { %3041 = vtanh.f32 %v1579_v12 }
 0x70d   :  { %v3042_v22 = vpop.eup %3041 }
 0x70e   :  { %v1671_v10 = vpack.c.bf16 %v3042_v22, %v3042_v22 }
 0x710   :  { %1704 = vmatprep.mubr.bf16.mxu0 %v1671_v10 }
 0x711   :  { %1705 = vmatmul.mubr.bf16.vlgmr.msra.gmra.mxu0 %v1670_v24 }
 0x712   :  { %2642 = vmatpush3.bf16.msra.mxu0 %v4009_v26 }
 0x713   :  { %2643 = vmatprep.subr.bf16.mxu0 %v4012_v15 }
 0x714   :  { %v2569_v6 = vpop.f32.mrf.mxu0 }
 0x716   :  { %v2570_v57 = vpop.f32.mrf.mxu0  ;;  %2644 = vmatpush3.bf16.msra.mxu0 %v4015_v30 }
 0x717   :  { %v2571_v62 = vadd.f32 %v2570_v57, %v2569_v6  ;;  %2645 = vmatprep.subr.bf16.mxu0 %v4018_v14 }
 0x718   :  { %v2572_v18 = vpop.f32.mrf.mxu0 }
 0x719   :  { %v1621_v4 = vadd.f32 %v4024_v21, %v2571_v62  ;;  %v2591_v50 = vpop.f32.mrf.mxu1 }
 0x71a   :  { %v2573_v41 = vpop.f32.mrf.mxu0  ;;  %2646 = vmatpush3.bf16.msra.mxu0 %v4027_v52 }
 0x71b   :  { %3043 = vtanh.f32 %v1621_v4  ;;  %v2592_v63 = vpop.f32.mrf.mxu1  ;;  %2647 = vmatprep.subr.bf16.mxu0 %v4030_v13 }
 0x71c   :  { %v2593_v27 = vadd.f32 %v2592_v63, %v2591_v50 }
 0x71d   :  { %v2594_v28 = vpop.f32.mrf.mxu1 }
 0x71e   :  { %v1663_v54 = vadd.f32 %v2593_v27, %v3649_v48  ;;  %2648 = vmatpush3.bf16.msra.mxu0 %v4034_v56  ;;  %v2988_v27 = vld [vmem:[#allocation8 + $0x30] sm:$0xff]   ;;  %v2990_v28 = vld [vmem:[#allocation8 + $0x20] sm:$0xff]  }
 0x71f   :  { %v2595_v29 = vpop.f32.mrf.mxu1  ;;  %2649 = vmatprep.subr.bf16.mxu0 %v4037_v49 }
 0x720   :  { %3045 = vtanh.f32 %v1663_v54  ;;  %v2991_v54 = vld [vmem:[#allocation8 + $0x18] sm:$0xff]   ;;  %v2993_v29 = vld [vmem:[#allocation8 + $0x8] sm:$0xff]  }
 0x722   :  { %2650 = vmatpush3.bf16.msra.mxu0 %v4040_v51 }
 0x723   :  { %2651 = vmatprep.subr.bf16.mxu0 %v4043_v38 }
 0x726   :  { %2652 = vmatpush3.bf16.msra.mxu0 %v4046_v53 }
 0x727   :  { %2653 = vmatprep.subr.bf16.mxu0 %v4049_v55 }
 0x728   :  { %v3044_v32 = vpop.eup %3043 }
 0x729   :  { %v1713_v34 = vpack.c.bf16 %v3044_v32, %v3044_v32 }
 0x72a   :  { %2654 = vmatpush3.bf16.msra.mxu0 %v4052_v36 }
 0x72b   :  { %1746 = vmatprep.mubr.bf16.mxu1 %v1713_v34  ;;  %2655 = vmatprep.subr.bf16.mxu0 %v4055_v31 }
 0x72c   :  { %1747 = vmatmul.mubr.bf16.vlgmr.msra.gmra.mxu1 %v1671_v10 }
 0x72d   :  { %v3046_v37 = vpop.eup %3045  ;;  %2664 = vmatpush3.bf16.msra.mxu1 %v3901_v58 }
 0x72e   :  { %2656 = vmatpush3.bf16.msra.mxu0 %v4059_v7  ;;  %v1755_v39 = vpack.c.bf16 %v3046_v37, %v3046_v37  ;;  %2665 = vmatprep.subr.bf16.mxu1 %v3904_v59  ;;  %v4064_v33 = vadd.f32 %v3046_v37, %v3963_v40 }
 0x72f   :  { %2685 = vmatprep.subr.bf16.mxu0 %v3995_v44 }
 0x730   :  { %1788 = vmatprep.mubr.bf16.mxu0 %v1755_v39  ;;  %v2120_v39 = vld [vmem:[%s4140_s5] ss:$0 sm:$0xff] }
 0x731   :  { %1789 = vmatmul.mubr.bf16.vlgmr.msra.gmra.mxu0 %v1713_v34  ;;  %2666 = vmatpush3.bf16.msra.mxu1 %v3907_v60 }
 0x732   :  { %2686 = vmatpush3.bf16.msra.mxu0 %v4009_v26  ;;  %2667 = vmatprep.subr.bf16.mxu1 %v3910_v61 }
 0x733   :  { %2687 = vmatprep.subr.bf16.mxu0 %v4012_v15 }
 0x735   :  { %2668 = vmatpush3.bf16.msra.mxu1 %v3913_v17 }
 0x736   :  { %2688 = vmatpush3.bf16.msra.mxu0 %v4015_v30  ;;  %2669 = vmatprep.subr.bf16.mxu1 %v3916_v19 }
 0x737   :  { %2689 = vmatprep.subr.bf16.mxu0 %v4018_v14 }
 0x739   :  { %2670 = vmatpush3.bf16.msra.mxu1 %v3925_v2 }
 0x73a   :  { %2690 = vmatpush3.bf16.msra.mxu0 %v4027_v52  ;;  %2671 = vmatprep.subr.bf16.mxu1 %v3928_v11 }
 0x73b   :  { %2691 = vmatprep.subr.bf16.mxu0 %v4030_v13 }
 0x73d   :  { %2672 = vmatpush3.bf16.msra.mxu1 %v3931_v35 }
 0x73e   :  { %2692 = vmatpush3.bf16.msra.mxu0 %v4034_v56  ;;  %2673 = vmatprep.subr.bf16.mxu1 %v3934_v16 }
 0x73f   :  { %2693 = vmatprep.subr.bf16.mxu0 %v4037_v49 }
 0x741   :  { %2674 = vmatpush3.bf16.msra.mxu1 %v3988_v42 }
 0x742   :  { %2694 = vmatpush3.bf16.msra.mxu0 %v4040_v51  ;;  %2675 = vmatprep.subr.bf16.mxu1 %v3991_v43 }
 0x743   :  { %2695 = vmatprep.subr.bf16.mxu0 %v4043_v38 }
 0x745   :  { %2676 = vmatpush3.bf16.msra.mxu1 %v3998_v45 }
 0x746   :  { %2696 = vmatpush3.bf16.msra.mxu0 %v4046_v53  ;;  %2677 = vmatprep.subr.bf16.mxu1 %v4001_v46 }
 0x747   :  { %2697 = vmatprep.subr.bf16.mxu0 %v4049_v55 }
 0x749   :  { %2678 = vmatpush3.bf16.msra.mxu1 %v4004_v47 }
 0x74a   :  { %2698 = vmatpush3.bf16.msra.mxu0 %v4052_v36  ;;  %2707 = vmatprep.subr.bf16.mxu1 %v3995_v44 }
 0x74b   :  { %2699 = vmatprep.subr.bf16.mxu0 %v4055_v31 }
 0x74e   :  { %2700 = vmatpush3.bf16.msra.mxu0 %v4059_v7 }
 0x74f   :  { %2898 = vmatprep.subr.bf16.mxu0 %v4159_v0 }
 0x7d1   :  { %v2613_v58 = vpop.f32.mrf.mxu0 }
 0x7d3   :  { %v2614_v59 = vpop.f32.mrf.mxu0 }
 0x7d4   :  { %v2615_v17 = vadd.f32 %v2614_v59, %v2613_v58 }
 0x7d5   :  { %v2616_v60 = vpop.f32.mrf.mxu0 }
 0x7d6   :  { %v1707_v2 = vadd.f32 %v3922_v20, %v2615_v17 }
 0x7d7   :  { %v2617_v61 = vpop.f32.mrf.mxu0 }
 0x7d8   :  { %3047 = vtanh.f32 %v1707_v2 }
 0x7e5   :  { %v3048_v5 = vpop.eup %3047 }
 0x7e6   :  { %v1798_v20 = vpack.c.bf16 %v3048_v5, %v3048_v5 }
 0x7ec   :  { %v2635_v19 = vpop.f32.mrf.mxu1 }
 0x7ee   :  { %v2636_v11 = vpop.f32.mrf.mxu1 }
 0x7ef   :  { %v2637_v35 = vadd.f32 %v2636_v11, %v2635_v19 }
 0x7f0   :  { %v2638_v16 = vpop.f32.mrf.mxu1 }
 0x7f1   :  { %v1749_v40 = vadd.f32 %v4024_v21, %v2637_v35  ;;  %v2657_v42 = vpop.f32.mrf.mxu0 }
 0x7f2   :  { %v2639_v43 = vpop.f32.mrf.mxu1 }
 0x7f3   :  { %3049 = vtanh.f32 %v1749_v40  ;;  %v2658_v44 = vpop.f32.mrf.mxu0 }
 0x7f4   :  { %v2659_v45 = vadd.f32 %v2658_v44, %v2657_v42 }
 0x7f5   :  { %v2660_v46 = vpop.f32.mrf.mxu0 }
 0x7f6   :  { %v1791_v47 = vadd.f32 %v2659_v45, %v3649_v48  ;;  %v2987_v48 = vld [vmem:[#allocation8 + $0x38] sm:$0xff]  }
 0x7f7   :  { %v2661_v23 = vpop.f32.mrf.mxu0 }
 0x7f8   :  { %3051 = vtanh.f32 %v1791_v47 }
 0x800   :  { %v3050_v25 = vpop.eup %3049 }
 0x801   :  { %v1799_v1 = vpack.c.bf16 %v3050_v25, %v3050_v25 }
 0x803   :  { %1832 = vmatprep.mubr.bf16.mxu1 %v1799_v1 }
 0x804   :  { %1833 = vmatmul.mubr.bf16.vlgmr.msra.gmra.mxu1 %v1798_v20 }
 0x805   :  { %v3052_v3 = vpop.eup %3051  ;;  %2708 = vmatpush3.bf16.msra.mxu1 %v4009_v26 }
 0x806   :  { %v1841_v12 = vpack.c.bf16 %v3052_v3, %v3052_v3  ;;  %2709 = vmatprep.subr.bf16.mxu1 %v4012_v15  ;;  %v1797_v8 = vadd.f32 %v3052_v3, %v4064_v33 }
 0x808   :  { %1874 = vmatprep.mubr.bf16.mxu0 %v1841_v12 }
 0x809   :  { %1875 = vmatmul.mubr.bf16.vlgmr.msra.gmra.mxu0 %v1799_v1  ;;  %2710 = vmatpush3.bf16.msra.mxu1 %v4015_v30 }
 0x80a   :  { %2711 = vmatprep.subr.bf16.mxu1 %v4018_v14  ;;  %2914 = vmatprep.mubr.msk.bf16.mxu0 %vm3235_vm0, %v4159_v0  ;;  %v3117_v14 = vld [vmem:[%s4138_s3 + $0x2] ss:$0 sm:$0xff] }
 0x80b   :  { %2899 = vmatpush3.bf16.msra.mxu0 %v2987_v48 }
 0x80c   :  { %2900 = vmatprep.subr.bf16.mxu0 %v4159_v0 }
 0x80d   :  { %2712 = vmatpush3.bf16.msra.mxu1 %v4027_v52 }
 0x80e   :  { %2713 = vmatprep.subr.bf16.mxu1 %v4030_v13 }
 0x80f   :  { %2901 = vmatpush3.bf16.msra.mxu0 %v2988_v27 }
 0x810   :  { %2902 = vmatprep.subr.bf16.mxu0 %v4159_v0 }
 0x811   :  { %2714 = vmatpush3.bf16.msra.mxu1 %v4034_v56  ;;  %v2992_v56 = vld [vmem:[#allocation8 + $0x10] sm:$0xff]  }
 0x812   :  { %2715 = vmatprep.subr.bf16.mxu1 %v4037_v49  ;;  %v2994_v49 = vld [vmem:[#allocation8] sm:$0xff]  }
 0x815   :  { %2716 = vmatpush3.bf16.msra.mxu1 %v4040_v51 }
 0x816   :  { %2717 = vmatprep.subr.bf16.mxu1 %v4043_v38 }
 0x819   :  { %2718 = vmatpush3.bf16.msra.mxu1 %v4046_v53 }
 0x81a   :  { %2719 = vmatprep.subr.bf16.mxu1 %v4049_v55 }
 0x81d   :  { %2720 = vmatpush3.bf16.msra.mxu1 %v4052_v36 }
 0x81e   :  { %2721 = vmatprep.subr.bf16.mxu1 %v4055_v31 }
 0x821   :  { %2722 = vmatpush3.bf16.msra.mxu1 %v4059_v7 }
 0x8c4   :  { %v2679_v9 = vpop.f32.mrf.mxu1 }
 0x8c6   :  { %v2680_v22 = vpop.f32.mrf.mxu1 }
 0x8c7   :  { %v2681_v10 = vadd.f32 %v2680_v22, %v2679_v9 }
 0x8c8   :  { %v2682_v24 = vpop.f32.mrf.mxu1 }
 0x8c9   :  { %v2701_v26 = vpop.f32.mrf.mxu0  ;;  %v1835_v6 = vadd.f32 %v4024_v21, %v2681_v10  ;;  %v2989_v21 = vld [vmem:[#allocation8 + $0x28] sm:$0xff]  }
 0x8ca   :  { %v2683_v15 = vpop.f32.mrf.mxu1  ;;  %2903 = vmatpush3.bf16.msra.mxu0 %v2989_v21 }
 0x8cb   :  { %v2702_v57 = vpop.f32.mrf.mxu0  ;;  %3053 = vtanh.f32 %v1835_v6  ;;  %2904 = vmatprep.subr.bf16.mxu0 %v4159_v0 }
 0x8cc   :  { %v2703_v30 = vadd.f32 %v2702_v57, %v2701_v26 }
 0x8cd   :  { %v2704_v62 = vpop.f32.mrf.mxu0 }
 0x8ce   :  { %v1877_v18 = vadd.f32 %v3117_v14, %v2703_v30  ;;  %2905 = vmatpush3.bf16.msra.mxu0 %v2990_v28 }
 0x8cf   :  { %v2705_v4 = vpop.f32.mrf.mxu0  ;;  %2906 = vmatprep.subr.bf16.mxu0 %v4159_v0 }
 0x8d0   :  { %3055 = vtanh.f32 %v1877_v18 }
 0x8d2   :  { %2907 = vmatpush3.bf16.msra.mxu0 %v2991_v54 }
 0x8d3   :  { %2908 = vmatprep.subr.bf16.mxu0 %v4159_v0 }
 0x8d6   :  { %2909 = vmatpush3.bf16.msra.mxu0 %v2992_v56 }
 0x8d7   :  { %2910 = vmatprep.subr.bf16.mxu0 %v4159_v0 }
 0x8d8   :  { %v3054_v50 = vpop.eup %3053 }
 0x8d9   :  { %v1884_v13 = vpack.c.bf16 %v3054_v50, %v3054_v50 }
 0x8da   :  { %2911 = vmatpush3.bf16.msra.mxu0 %v2993_v29 }
 0x8db   :  { %2912 = vmatprep.subr.bf16.mxu0 %v4159_v0 }
 0x8dd   :  { %v3056_v41 = vpop.eup %3055 }
 0x8de   :  { %v1885_v52 = vpack.c.bf16 %v3056_v41, %v3056_v41  ;;  %v1883_v63 = vadd.f32 %v3056_v41, %v1797_v8  ;;  %2913 = vmatpush3.bf16.msra.mxu0 %v2994_v49 }
 0x8e0   :  { %1918 = vmatprep.mubr.bf16.mxu1 %v1885_v52 }
 0x8e1   :  { %1919 = vmatmul.mubr.bf16.vlgmr.msra.gmra.mxu1 %v1884_v13 }
 0x9a1   :  { %v2723_v51 = vpop.f32.mrf.mxu1 }
 0x9a3   :  { %v2724_v38 = vpop.f32.mrf.mxu1 }
 0x9a4   :  { %v2725_v53 = vadd.f32 %v2724_v38, %v2723_v51 }
 0x9a5   :  { %v2726_v55 = vpop.f32.mrf.mxu1 }
 0x9a6   :  { %v1921_v32 = vadd.f32 %v3117_v14, %v2725_v53 }
 0x9a7   :  { %v2727_v34 = vpop.f32.mrf.mxu1 }
 0x9a8   :  { %3057 = vtanh.f32 %v1921_v32 }
 0x9b5   :  { %v3058_v36 = vpop.eup %3057 }
 0x9b6   :  { %v1927_v31 = vadd.f32 %v3058_v36, %v1883_v63 }
 0x9b8   :  { %v1928_v37 = vmul.f32 0.125, %v1927_v31 }
 0x9ba   :  { %v1929_v7 = vpack.c.bf16 %v1928_v37, %v1928_v37 }
 0x9bc   :  { %2915 = vmatmul.mubr.bf16.vlgmr.msra.gmra.mxu0 %v1929_v7 }
 0xa7c   :  { %v2035_v0 = vpop.f32.mrf.mxu0 }
 0xa7d   :  { %v2036_v33 = vadd.f32 %v2120_v39, %v2035_v0 }
 0xa7e   :  { %v2916_v58 = vpop.f32.mrf.mxu0 }
 0xa7f   :  { %2041 = vst [vmem:[#allocation10] sm:$0xff] %v2036_v33 }
 0xa80   :  { %v2038_v59 = vpop.f32.mrf.mxu0 }
 0xa81   :  { %3209 = shalt.err (!%p3206_p10)
}
 0xa82   :  { %2051 = dma.vmem_to_hbm [thread:$0]  %s2049_s7, 128, %s4141_s6, [#allocation4]   ;;  %v2917_v60 = vpop.f32.mrf.mxu0 }
 0xa83   :  { %3224 = dma.done.wait [#allocation4], 128  }
 0xa84   :  { %3225 = vsyncadd [#allocation4], 4294967168 }
 0xa85   :  { %2055 = vsyncpa [#allocation3], 1 }
 0xa86   :  { %2056 = vsyncpa [#allocation6], 1 }
 0xa87   :  { %2057 = vsyncpa [#allocation9], 1 }
 0xa88   :  { %2058 = vsyncpa [#allocation4], 1 }

</bundles_post_ra>
